<compile_context>
chip_gen: v5e
topology: v5e:2x2
jax: 0.10.0
libtpu: 0.0.40
codegen_flags: <defaults>
</compile_context>

<pallas_src>
import numpy as np
import jax
import jax.numpy as jnp
from jax import lax
from jax.experimental import pallas as pl
from jax.experimental.pallas import tpu as pltpu


def _round_up(x, m):
    return ((x + m - 1) // m) * m


def _make_kernel(group_Q, group_K, softmax_temp, Bt, N, C_pad, D,
                 shared_groups, cdtype):
    """Kernel specialised (statically) on grouping flags / tile sizes / dtypes."""

    L = C_pad if group_K else N          # key axis of the attention matrix
    need_onehot = group_Q or group_K

    def kernel(groups_ref, q_ref, k_ref, v_ref, out_ref, a0_ref):
        # Loop-invariant constants, hoisted once per grid step (JAX does not
        # CSE broadcast_in_dim, so never rebuild these per batch element).
        if need_onehot:
            cluster_iota = lax.broadcasted_iota(jnp.int32, (C_pad, N), 0)     # (C_pad, N)
        key_sel = (lax.broadcasted_iota(jnp.int32, (1, L), 1) == 0
                   ).astype(jnp.float32)                                       # (1, L)
        if group_K:
            ones_row = jnp.ones((1, N), jnp.float32)

        def build_onehot(g_row):
            """Transposed one-hot in (C_pad, N) lane-major layout + counts."""
            onehot_f32 = (g_row == cluster_iota).astype(jnp.float32)           # (C_pad, N)
            counts_col = jnp.sum(onehot_f32, axis=1, keepdims=True)            # (C_pad, 1)
            # Guard empty / padded clusters (counts == 0) against inf/NaN.
            inv_counts = jnp.where(counts_col > 0.0, 1.0 / counts_col, 0.0)
            if group_K:
                # Lane-major counts row (1, C_pad) via one tiny MXU contraction
                # (no sublane->lane relayout).
                counts_row = lax.dot_general(
                    ones_row, onehot_f32, (((1,), (1,)), ((), ())),
                    preferred_element_type=jnp.float32)
            else:
                counts_row = None
            return onehot_f32.astype(cdtype), inv_counts, counts_row

        # Common case (torch .repeat of a single clusters row): the one-hot and
        # its counts are identical for every batch element, so build them once
        # per grid step instead of once per element.
        if need_onehot and shared_groups:
            shared = build_onehot(groups_ref[0])                               # (1, N) row

        def body(b, carry):
            q = q_ref[b]                 # (N, D)
            k = k_ref[b]                 # (N, D)
            v = v_ref[b]                 # (N, D)

            if need_onehot:
                if shared_groups:
                    onehot_c, inv_counts, counts_row = shared
                else:
                    onehot_c, inv_counts, counts_row = build_onehot(groups_ref[b])

                def center(x):
                    # "CalcCenter" segment mean: (C_pad,N)@(N,D), scaled 1/count.
                    c = jnp.dot(onehot_c, x.astype(cdtype),
                                preferred_element_type=jnp.float32) * inv_counts
                    return c.astype(cdtype)

                Qc = center(q) if group_Q else q.astype(cdtype)
                if group_K:
                    Kc = center(k)
                    Vc = center(v)
                else:
                    Kc = k.astype(cdtype)
                    Vc = v.astype(cdtype)
            else:
                Qc = q.astype(cdtype)
                Kc = k.astype(cdtype)
                Vc = v.astype(cdtype)

            # QK^T without materializing Kc.T: contract the shared D axis.
            qk = softmax_temp * lax.dot_general(
                Qc, Kc, (((1,), (1,)), ((), ())),
                preferred_element_type=jnp.float32)                            # (M, L) f32

            if group_K:
                # Mask padded / empty key-cluster columns (zero centers -> logit
                # 0) before taking the max, so they cannot force every real
                # exp() to underflow and NaN the folded denominator.
                qk = jnp.where(counts_row > 0.0, qk, -jnp.inf)

            # (Weighted) softmax over keys / key-clusters with the two
            # normalizations folded:  group_K: A = (e*counts)/sum(e*counts)
            #                         else:    A = e / sum(e)
            mx = jnp.max(qk, axis=-1, keepdims=True)
            e = jnp.exp(qk - mx)
            w = e * counts_row if group_K else e
            denom = jnp.sum(w, axis=-1, keepdims=True)
            A_full = w * pl.reciprocal(denom, approx=True)                     # (M, L) f32

            # TODO(synk): attention_dropout > 0 (torch.nn.Dropout on A) not implemented.

            out_v = jnp.dot(A_full.astype(cdtype), Vc,
                            preferred_element_type=jnp.float32)                # (M, D) f32

            if group_Q:
                # Broadcast centers back to token positions: trans_a dot_general
                # (MXU-native, no transpose of the one-hot).
                out = lax.dot_general(
                    onehot_c, out_v.astype(cdtype), (((0,), (0,)), ((), ())),
                    preferred_element_type=jnp.float32)                        # (N, D)
            else:
                out = out_v
            out_ref[b] = out.astype(out_ref.dtype)

            # Lane-dense a0: extract A_full[:, 0] as a (1, M) row via a selector
            # matmul (avoids masked single-lane column stores).
            a0_row = lax.dot_general(key_sel, A_full, (((1,), (1,)), ((), ())),
                                     preferred_element_type=jnp.float32)       # (1, M)
            a0_ref[b] = a0_row.astype(a0_ref.dtype)
            return carry

        # Short fixed trip count: fori_loop (unrolled) bounds live ranges per
        # element while keeping the scheduler's view of the loop structure.
        lax.fori_loop(0, Bt, body, 0, unroll=True)

    return kernel


def _pick_block_batch(B, N, D, C_pad, in_itemsize, vmem_cap):
    """Batch elements per grid step (a divisor of B), sized from this chip's VMEM."""
    LQ = max(C_pad, N)
    # Double-buffered per-element I/O tiles + per-element f32 intermediates.
    io_bytes = 2 * (3 * N * D * in_itemsize        # q, k, v
                    + N * D * in_itemsize          # out
                    + N * 4                        # groups
                    + LQ * 4)                      # a0 row
    inter_bytes = (C_pad * N * 4                   # one-hot
                   + 3 * C_pad * D * 4             # Q/K/V centers
                   + 2 * LQ * LQ * 4)              # qk / A_full
    per_elem = io_bytes + inter_bytes
    budget = int(0.6 * vmem_cap)                   # headroom for pipelined tiles
    # v7x-like parts (<= 64 MiB VMEM/TC) have 2 TensorCores: keep >= 2 grid
    # steps so the "parallel" axis spans both cores. Single-TC parts (v5e/v6e,
    # 128 MiB) may take the whole batch in one step.
    hard_cap = max(1, B // 2) if vmem_cap <= 64 * 1024 * 1024 else B
    cap = max(1, min(budget // max(per_elem, 1), 8, hard_cap))
    best = 1                                       # largest divisor of B <= cap
    for cand in range(1, min(cap, B) + 1):
        if B % cand == 0:
            best = cand
    return best


def ada_clustering_attention(queries, keys, values, clusters,
                             group_Q=False, group_K=False,
                             softmax_temp=1.0, number_clusters=128,
                             prefer_bf16_matmul=False):
    """JAX/Pallas equivalent of AdaClusteringAttention.forward (no mask, no dropout).

    Returns (V, A_full[:, :, 0]) just like the PyTorch module.
    """
    # TODO(synk): key_padding_mask branch (only legal when group_K=False) not implemented.
    B, N, D = queries.shape
    C = number_clusters + 1
    # Pad the cluster axis to a lane-friendly multiple of 128; padded (and empty)
    # clusters are masked out via zero counts / -inf logits inside the kernel.
    C_pad = _round_up(C, 128)

    try:
        vmem_cap = int(pltpu.get_tpu_info().vmem_capacity_bytes)
    except Exception:
        vmem_cap = 64 * 1024 * 1024            # conservative (v7x-sized) fallback

    shared_groups = (clusters.shape[0] == 1)
    M = C_pad if group_Q else N
    Bt = _pick_block_batch(B, N, D, C_pad, queries.dtype.itemsize, vmem_cap)

    if shared_groups:
        groups3 = clusters.astype(jnp.int32)[:, None, :]              # (1, 1, N)
        groups_spec = pl.BlockSpec((1, 1, N), lambda i: (0, 0, 0))    # constant tile
    else:
        rep = B // clusters.shape[0]
        groups = jnp.tile(clusters.astype(jnp.int32), (rep, 1))       # (B, N)
        groups3 = groups[:, None, :]                                  # (B, 1, N) lane-major
        groups_spec = pl.BlockSpec((Bt, 1, N), lambda i: (i, 0, 0))

    # MXU compute dtype: bf16 inputs stay bf16; f32 inputs optionally downcast
    # MXU operands to bf16 (f32 accumulation, f32 softmax math) for throughput.
    cdtype = jnp.bfloat16 if prefer_bf16_matmul else queries.dtype

    kernel = _make_kernel(bool(group_Q), bool(group_K), float(softmax_temp),
                          Bt, N, C_pad, D, shared_groups, cdtype)

    vmem_limit = min(int(0.75 * vmem_cap), 100 * 1024 * 1024)

    out, a0 = pl.pallas_call(
        kernel,
        out_shape=(jax.ShapeDtypeStruct((B, N, D), queries.dtype),
                   jax.ShapeDtypeStruct((B, 1, M), jnp.float32)),
        grid_spec=pltpu.PrefetchScalarGridSpec(
            num_scalar_prefetch=0,
            grid=(B // Bt,),
            in_specs=[groups_spec,                                    # groups (lane-major)
                      pl.BlockSpec((Bt, N, D), lambda i: (i, 0, 0)),  # queries
                      pl.BlockSpec((Bt, N, D), lambda i: (i, 0, 0)),  # keys
                      pl.BlockSpec((Bt, N, D), lambda i: (i, 0, 0))], # values
            out_specs=[pl.BlockSpec((Bt, N, D), lambda i: (i, 0, 0)),
                       pl.BlockSpec((Bt, 1, M), lambda i: (i, 0, 0))]),
        compiler_params=pltpu.CompilerParams(
            dimension_semantics=("parallel",),
            vmem_limit_bytes=vmem_limit),
    )(groups3, queries, keys, values)

    a0 = a0[:, 0, :C] if group_Q else a0[:, 0, :]
    return out, a0


def _reference(queries, keys, values, clusters, group_Q, group_K,
               softmax_temp, number_clusters):
    """Plain-JAX reference reproducing the PyTorch forward semantics (f32)."""
    B, N, D = queries.shape
    C = number_clusters + 1
    rep = B // clusters.shape[0]
    groups = jnp.tile(clusters.astype(jnp.int32), (rep, 1))
    onehot = jax.nn.one_hot(groups, C, dtype=jnp.float32)             # (B, N, C)
    counts = onehot.sum(axis=1)                                       # (B, C)
    inv = jnp.where(counts > 0, 1.0 / counts, 0.0)
    q32 = queries.astype(jnp.float32)
    k32 = keys.astype(jnp.float32)
    v32 = values.astype(jnp.float32)
    if group_Q:
        Qc = jnp.einsum('bnc,bnd->bcd', onehot, q32) * inv[:, :, None]
    else:
        Qc = q32
    if group_K:
        Kc = jnp.einsum('bnc,bnd->bcd', onehot, k32) * inv[:, :, None]
        Vc = jnp.einsum('bnc,bnd->bcd', onehot, v32) * inv[:, :, None]
    else:
        Kc, Vc = k32, v32
    qk = softmax_temp * jnp.einsum('bmd,bld->bml', Qc, Kc)
    A = jax.nn.softmax(qk, axis=-1)
    if group_K:
        A = A * counts[:, None, :]
        A = A / A.sum(axis=-1, keepdims=True)
    out = jnp.einsum('bml,bld->bmd', A, Vc)
    if group_Q:
        out = jnp.einsum('bnc,bcd->bnd', onehot, out)
    return out, A[:, :, 0]


if __name__ == "__main__":
    key = jax.random.PRNGKey(0)
    B, N, D = 2, 16, 32
    number_clusters = 3      # C = 4 cluster slots (padded to 128 inside the kernel)
    softmax_temp = 0.5

    kq, kk, kv = jax.random.split(key, 3)
    queries = jax.random.normal(kq, (B, N, D), dtype=jnp.float32)
    keys_ = jax.random.normal(kk, (B, N, D), dtype=jnp.float32)
    values = jax.random.normal(kv, (B, N, D), dtype=jnp.float32)

    # Cluster assignments shared across the batch (Bc=1, repeated to B like torch
    # .repeat); every cluster id is occupied so all real counts are nonzero.
    clusters = (jnp.arange(N, dtype=jnp.int32) % (number_clusters + 1))[None, :]

    # f32 path: tolerance allows for the approximate EUP reciprocal in softmax.
    for gQ, gK in [(True, True), (True, False), (False, True), (False, False)]:
        out, a0 = ada_clustering_attention(
            queries, keys_, values, clusters,
            group_Q=gQ, group_K=gK,
            softmax_temp=softmax_temp, number_clusters=number_clusters)
        (out, a0) = jax.block_until_ready((out, a0))

        ref_out, ref_a0 = _reference(
            queries, keys_, values, clusters, gQ, gK,
            softmax_temp, number_clusters)
        np.testing.assert_allclose(np.asarray(out), np.asarray(ref_out),
                                   rtol=1e-2, atol=1e-2)
        np.testing.assert_allclose(np.asarray(a0), np.asarray(ref_a0),
                                   rtol=1e-2, atol=1e-2)

    # Edge case from the review: group_K with every real logit strongly negative
    # used to NaN via the unmasked padded (zero-logit) columns. Construct
    # all-negative logits and verify the masked kernel stays finite & matches.
    q_pos = jnp.abs(queries)
    k_neg = -20.0 * q_pos
    out_e, a0_e = ada_clustering_attention(
        q_pos, k_neg, values, clusters, group_Q=False, group_K=True,
        softmax_temp=softmax_temp, number_clusters=number_clusters)
    (out_e, a0_e) = jax.block_until_ready((out_e, a0_e))
    assert bool(jnp.isfinite(out_e).all()) and bool(jnp.isfinite(a0_e).all())
    ref_out_e, ref_a0_e = _reference(q_pos, k_neg, values, clusters,
                                     False, True, softmax_temp, number_clusters)
    np.testing.assert_allclose(np.asarray(out_e), np.asarray(ref_out_e),
                               rtol=1e-2, atol=1e-2)
    np.testing.assert_allclose(np.asarray(a0_e), np.asarray(ref_a0_e),
                               rtol=1e-2, atol=1e-2)

    # f32 inputs with bf16 MXU operands (v5e-targeted throughput mode).
    out_p, a0_p = ada_clustering_attention(
        queries, keys_, values, clusters, group_Q=True, group_K=True,
        softmax_temp=softmax_temp, number_clusters=number_clusters,
        prefer_bf16_matmul=True)
    (out_p, a0_p) = jax.block_until_ready((out_p, a0_p))
    ref_out, ref_a0 = _reference(queries, keys_, values, clusters, True, True,
                                 softmax_temp, number_clusters)
    np.testing.assert_allclose(np.asarray(out_p), np.asarray(ref_out),
                               rtol=5e-2, atol=5e-2)
    np.testing.assert_allclose(np.asarray(a0_p), np.asarray(ref_a0),
                               rtol=5e-2, atol=5e-2)

    # bf16 inputs feed the MXU directly (no wrapper upcast); loose tolerance check.
    qb, kb, vb = (x.astype(jnp.bfloat16) for x in (queries, keys_, values))
    out_b, a0_b = ada_clustering_attention(
        qb, kb, vb, clusters, group_Q=True, group_K=True,
        softmax_temp=softmax_temp, number_clusters=number_clusters)
    (out_b, a0_b) = jax.block_until_ready((out_b, a0_b))
    np.testing.assert_allclose(np.asarray(out_b.astype(jnp.float32)),
                               np.asarray(ref_out), rtol=5e-2, atol=5e-2)
    np.testing.assert_allclose(np.asarray(a0_b), np.asarray(ref_a0),
                               rtol=5e-2, atol=5e-2)

    print("KERNEL_OK")
</pallas_src>

<mosaic_0001>
module attributes {stable_mosaic.version = 11 : i64} {
  func.func @kernel(%arg0: i32, %arg1: memref<1x1x16xi32, #tpu.memory_space<vmem>>, %arg2: memref<1x16x32xf32, #tpu.memory_space<vmem>>, %arg3: memref<1x16x32xf32, #tpu.memory_space<vmem>>, %arg4: memref<1x16x32xf32, #tpu.memory_space<vmem>>, %arg5: memref<1x16x32xf32, #tpu.memory_space<vmem>>, %arg6: memref<1x1x128xf32, #tpu.memory_space<vmem>>) attributes {dimension_semantics = [#tpu.dimension_semantics<parallel>], iteration_bounds = array<i64: 2>, scalar_prefetch = 0 : i64, scratch_operands = 0 : i64, tpu.core_type = #tpu.core_type<tc>, window_params = [{pipeline_mode = #tpu.pipeline_mode<synchronous>, transform_indices = @transform_0, window_bounds = array<i64: 1, 1, 16>}, {transform_indices = @transform_1, window_bounds = array<i64: 1, 16, 32>}, {transform_indices = @transform_2, window_bounds = array<i64: 1, 16, 32>}, {transform_indices = @transform_3, window_bounds = array<i64: 1, 16, 32>}, {transform_indices = @transform_4, window_bounds = array<i64: 1, 16, 32>}, {transform_indices = @transform_5, window_bounds = array<i64: 1, 1, 128>}]} {
    %0 = tpu.iota {dimensions = array<i32: 0>} : vector<128x16xi32>
    %1 = tpu.iota {dimensions = array<i32: 1>} : vector<1x128xi32>
    %c0_i32 = arith.constant 0 : i32
    %2 = vector.broadcast %c0_i32 : i32 to vector<1x128xi32>
    %3 = arith.cmpi eq, %1, %2 : vector<1x128xi32>
    %4 = arith.extui %3 : vector<1x128xi1> to vector<1x128xi32>
    %5 = arith.sitofp %4 : vector<1x128xi32> to vector<1x128xf32>
    %cst = arith.constant 1.000000e+00 : f32
    %6 = vector.broadcast %cst : f32 to vector<1x16xf32>
    %c0 = arith.constant 0 : index
    %c0_0 = arith.constant 0 : index
    %c0_1 = arith.constant 0 : index
    %7 = vector.load %arg1[%c0, %c0_0, %c0_1] : memref<1x1x16xi32, #tpu.memory_space<vmem>>, vector<1x1x16xi32>
    %8 = vector.shape_cast %7 : vector<1x1x16xi32> to vector<1x16xi32>
    %9 = vector.broadcast %8 : vector<1x16xi32> to vector<128x16xi32>
    %10 = arith.cmpi eq, %9, %0 : vector<128x16xi32>
    %11 = arith.extui %10 : vector<128x16xi1> to vector<128x16xi32>
    %12 = arith.sitofp %11 : vector<128x16xi32> to vector<128x16xf32>
    %cst_2 = arith.constant dense<0.000000e+00> : vector<128xf32>
    %13 = vector.multi_reduction <add>, %12, %cst_2 [1] : vector<128x16xf32> to vector<128xf32>
    %14 = vector.shape_cast %13 : vector<128xf32> to vector<128x1xf32>
    %cst_3 = arith.constant 0.000000e+00 : f32
    %15 = vector.broadcast %cst_3 : f32 to vector<128x1xf32>
    %16 = arith.cmpf ogt, %14, %15 : vector<128x1xf32>
    %cst_4 = arith.constant 1.000000e+00 : f32
    %17 = vector.broadcast %cst_4 : f32 to vector<128x1xf32>
    %18 = arith.divf %17, %14 : vector<128x1xf32>
    %cst_5 = arith.constant 0.000000e+00 : f32
    %19 = vector.broadcast %cst_5 : f32 to vector<128x1xf32>
    %20 = arith.select %16, %18, %19 : vector<128x1xi1>, vector<128x1xf32>
    %cst_6 = arith.constant dense<0.000000e+00> : vector<1x128xf32>
    %21 = tpu.matmul %6, %12, %cst_6 {dimension_numbers = #tpu.dot_dimension_numbers<[1], [1], [0], [0], [0, 0, 1, 0], [], []>} : vector<1x16xf32>, vector<128x16xf32>, vector<1x128xf32> -> vector<1x128xf32>
    %c0_i32_7 = arith.constant 0 : i32
    %22 = arith.index_cast %c0_i32_7 : i32 to index
    %c0_8 = arith.constant 0 : index
    %c0_9 = arith.constant 0 : index
    %23 = vector.load %arg2[%22, %c0_8, %c0_9] : memref<1x16x32xf32, #tpu.memory_space<vmem>>, vector<1x16x32xf32>
    %24 = vector.shape_cast %23 : vector<1x16x32xf32> to vector<16x32xf32>
    %25 = arith.index_cast %c0_i32_7 : i32 to index
    %c0_10 = arith.constant 0 : index
    %c0_11 = arith.constant 0 : index
    %26 = vector.load %arg3[%25, %c0_10, %c0_11] : memref<1x16x32xf32, #tpu.memory_space<vmem>>, vector<1x16x32xf32>
    %27 = vector.shape_cast %26 : vector<1x16x32xf32> to vector<16x32xf32>
    %28 = arith.index_cast %c0_i32_7 : i32 to index
    %c0_12 = arith.constant 0 : index
    %c0_13 = arith.constant 0 : index
    %29 = vector.load %arg4[%28, %c0_12, %c0_13] : memref<1x16x32xf32, #tpu.memory_space<vmem>>, vector<1x16x32xf32>
    %30 = vector.shape_cast %29 : vector<1x16x32xf32> to vector<16x32xf32>
    %cst_14 = arith.constant dense<0.000000e+00> : vector<128x32xf32>
    %31 = tpu.matmul %12, %24, %cst_14 {dimension_numbers = #tpu.dot_dimension_numbers<[1], [0], [0], [1], [0, 0, 1, 1], [], []>} : vector<128x16xf32>, vector<16x32xf32>, vector<128x32xf32> -> vector<128x32xf32>
    %32 = vector.broadcast %20 : vector<128x1xf32> to vector<128x32xf32>
    %33 = arith.mulf %31, %32 : vector<128x32xf32>
    %cst_15 = arith.constant dense<0.000000e+00> : vector<128x32xf32>
    %34 = tpu.matmul %12, %27, %cst_15 {dimension_numbers = #tpu.dot_dimension_numbers<[1], [0], [0], [1], [0, 0, 1, 1], [], []>} : vector<128x16xf32>, vector<16x32xf32>, vector<128x32xf32> -> vector<128x32xf32>
    %35 = vector.broadcast %20 : vector<128x1xf32> to vector<128x32xf32>
    %36 = arith.mulf %34, %35 : vector<128x32xf32>
    %cst_16 = arith.constant dense<0.000000e+00> : vector<128x32xf32>
    %37 = tpu.matmul %12, %30, %cst_16 {dimension_numbers = #tpu.dot_dimension_numbers<[1], [0], [0], [1], [0, 0, 1, 1], [], []>} : vector<128x16xf32>, vector<16x32xf32>, vector<128x32xf32> -> vector<128x32xf32>
    %38 = vector.broadcast %20 : vector<128x1xf32> to vector<128x32xf32>
    %39 = arith.mulf %37, %38 : vector<128x32xf32>
    %cst_17 = arith.constant dense<0.000000e+00> : vector<128x128xf32>
    %40 = tpu.matmul %33, %36, %cst_17 {dimension_numbers = #tpu.dot_dimension_numbers<[1], [1], [0], [0], [0, 0, 1, 0], [], []>} : vector<128x32xf32>, vector<128x32xf32>, vector<128x128xf32> -> vector<128x128xf32>
    %cst_18 = arith.constant 5.000000e-01 : f32
    %41 = vector.broadcast %cst_18 : f32 to vector<128x128xf32>
    %42 = arith.mulf %41, %40 : vector<128x128xf32>
    %cst_19 = arith.constant 0.000000e+00 : f32
    %43 = vector.broadcast %cst_19 : f32 to vector<1x128xf32>
    %44 = arith.cmpf ogt, %21, %43 : vector<1x128xf32>
    %cst_20 = arith.constant 0xFF800000 : f32
    %45 = vector.shape_cast %44 : vector<1x128xi1> to vector<1x128xi1>
    %46 = vector.broadcast %45 : vector<1x128xi1> to vector<128x128xi1>
    %47 = vector.broadcast %cst_20 : f32 to vector<128x128xf32>
    %48 = arith.select %46, %42, %47 : vector<128x128xi1>, vector<128x128xf32>
    %cst_21 = arith.constant dense<0xFF800000> : vector<128xf32>
    %49 = vector.multi_reduction <maximumf>, %48, %cst_21 [1] : vector<128x128xf32> to vector<128xf32>
    %50 = vector.shape_cast %49 : vector<128xf32> to vector<128x1xf32>
    %51 = vector.broadcast %50 : vector<128x1xf32> to vector<128x128xf32>
    %52 = arith.subf %48, %51 : vector<128x128xf32>
    %53 = math.exp %52 : vector<128x128xf32>
    %54 = vector.broadcast %21 : vector<1x128xf32> to vector<128x128xf32>
    %55 = arith.mulf %53, %54 : vector<128x128xf32>
    %cst_22 = arith.constant dense<0.000000e+00> : vector<128xf32>
    %56 = vector.multi_reduction <add>, %55, %cst_22 [1] : vector<128x128xf32> to vector<128xf32>
    %57 = vector.shape_cast %56 : vector<128xf32> to vector<128x1xf32>
    %58 = tpu.reciprocal %57 {approx = true} : vector<128x1xf32> -> vector<128x1xf32>
    %59 = vector.broadcast %58 : vector<128x1xf32> to vector<128x128xf32>
    %60 = arith.mulf %55, %59 : vector<128x128xf32>
    %cst_23 = arith.constant dense<0.000000e+00> : vector<128x32xf32>
    %61 = tpu.matmul %60, %39, %cst_23 {dimension_numbers = #tpu.dot_dimension_numbers<[1], [0], [0], [1], [0, 0, 1, 1], [], []>} : vector<128x128xf32>, vector<128x32xf32>, vector<128x32xf32> -> vector<128x32xf32>
    %cst_24 = arith.constant dense<0.000000e+00> : vector<16x32xf32>
    %62 = tpu.matmul %12, %61, %cst_24 {dimension_numbers = #tpu.dot_dimension_numbers<[0], [0], [1], [1], [0, 1, 1, 1], [], []>} : vector<128x16xf32>, vector<128x32xf32>, vector<16x32xf32> -> vector<16x32xf32>
    %63 = arith.index_cast %c0_i32_7 : i32 to index
    %c0_25 = arith.constant 0 : index
    %c0_26 = arith.constant 0 : index
    %64 = vector.load %arg5[%63, %c0_25, %c0_26] : memref<1x16x32xf32, #tpu.memory_space<vmem>>, vector<1x16x32xf32>
    %65 = vector.shape_cast %64 : vector<1x16x32xf32> to vector<16x32xf32>
    %66 = vector.shape_cast %62 : vector<16x32xf32> to vector<1x16x32xf32>
    tpu.vector_store %arg5[%63, %c0_25, %c0_26], %66 {strides = array<i32>} : memref<1x16x32xf32, #tpu.memory_space<vmem>>, vector<1x16x32xf32>,
    %cst_27 = arith.constant dense<0.000000e+00> : vector<1x128xf32>
    %67 = tpu.matmul %5, %60, %cst_27 {dimension_numbers = #tpu.dot_dimension_numbers<[1], [1], [0], [0], [0, 0, 1, 0], [], []>} : vector<1x128xf32>, vector<128x128xf32>, vector<1x128xf32> -> vector<1x128xf32>
    %68 = arith.index_cast %c0_i32_7 : i32 to index
    %c0_28 = arith.constant 0 : index
    %c0_29 = arith.constant 0 : index
    %69 = vector.load %arg6[%68, %c0_28, %c0_29] : memref<1x1x128xf32, #tpu.memory_space<vmem>>, vector<1x1x128xf32>
    %70 = vector.shape_cast %69 : vector<1x1x128xf32> to vector<1x128xf32>
    %71 = vector.shape_cast %67 : vector<1x128xf32> to vector<1x1x128xf32>
    tpu.vector_store %arg6[%68, %c0_28, %c0_29], %71 {strides = array<i32>} : memref<1x1x128xf32, #tpu.memory_space<vmem>>, vector<1x1x128xf32>,
    %c1_i32 = arith.constant 1 : i32
    return
  }
  func.func @transform_0(%arg0: i32) -> (i32, i32, i32) {
    %c0_i32 = arith.constant 0 : i32
    %c0_i32_0 = arith.constant 0 : i32
    %c0_i32_1 = arith.constant 0 : i32
    %c0_i32_2 = arith.constant 0 : i32
    return %c0_i32, %c0_i32_0, %c0_i32_1 : i32, i32, i32
  }
  func.func @transform_1(%arg0: i32) -> (i32, i32, i32) {
    %c0_i32 = arith.constant 0 : i32
    %c0_i32_0 = arith.constant 0 : i32
    %c0_i32_1 = arith.constant 0 : i32
    return %arg0, %c0_i32, %c0_i32_0 : i32, i32, i32
  }
  func.func @transform_2(%arg0: i32) -> (i32, i32, i32) {
    %c0_i32 = arith.constant 0 : i32
    %c0_i32_0 = arith.constant 0 : i32
    %c0_i32_1 = arith.constant 0 : i32
    return %arg0, %c0_i32, %c0_i32_0 : i32, i32, i32
  }
  func.func @transform_3(%arg0: i32) -> (i32, i32, i32) {
    %c0_i32 = arith.constant 0 : i32
    %c0_i32_0 = arith.constant 0 : i32
    %c0_i32_1 = arith.constant 0 : i32
    return %arg0, %c0_i32, %c0_i32_0 : i32, i32, i32
  }
  func.func @transform_4(%arg0: i32) -> (i32, i32, i32) {
    %c0_i32 = arith.constant 0 : i32
    %c0_i32_0 = arith.constant 0 : i32
    %c0_i32_1 = arith.constant 0 : i32
    return %arg0, %c0_i32, %c0_i32_0 : i32, i32, i32
  }
  func.func @transform_5(%arg0: i32) -> (i32, i32, i32) {
    %c0_i32 = arith.constant 0 : i32
    %c0_i32_0 = arith.constant 0 : i32
    %c0_i32_1 = arith.constant 0 : i32
    return %arg0, %c0_i32, %c0_i32_0 : i32, i32, i32
  }
}

</mosaic_0001>

<bundles_post_ra>
// kernel: tpu_custom_call.1
= control target key start
LH: loop header
LB: loop body
LE: loop exit
PB: predicated region body
PF: predicated region fallthrough
CT: control target
= control target key end

     0   :  { %s3879_s0 = inlined_call_operand.hbm [shape: s32[1,1,16], index: 0, kind: input, shape index: {}]   ;;  %s3880_s1 = inlined_call_operand.hbm [shape: f32[2,16,32], index: 1, kind: input, shape index: {}]   ;;  %s3881_s2 = inlined_call_operand.hbm [shape: f32[2,16,32], index: 2, kind: input, shape index: {}]   ;;  %s3882_s3 = inlined_call_operand.hbm [shape: f32[2,16,32], index: 3, kind: input, shape index: {}]   ;;  %s3883_s4 = inlined_call_operand.hbm [shape: f32[2,16,32], index: 4, kind: output, shape index: {0}]   ;;  %s3884_s5 = inlined_call_operand.hbm [shape: f32[2,1,128], index: 5, kind: output, shape index: {1}]  }
   0x1   :  { %3907 = sst [smem:[#allocation41_spill]] %s3879_s0 }
   0x2   :  { %3908 = sst [smem:[#allocation42_spill]] %s3880_s1 }
   0x3   :  { %3909 = sst [smem:[#allocation43_spill]] %s3881_s2 }
   0x4   :  { %11 = vsyncpa [#allocation3], 0 }
   0x5   :  { %12 = vsyncpa [#allocation6], 0 }
   0x6   :  { %14 = vsyncpa [#allocation6 + $0x1], 0 }
   0x7   :  { %15 = vsyncpa [#allocation9], 0 }
   0x8   :  { %17 = vsyncpa [#allocation9 + $0x1], 0 }
   0x9   :  { %18 = vsyncpa [#allocation4], 0 }
   0xa   :  { %20 = vsyncpa [#allocation4 + $0x1], 0 }
   0xb   :  { %21 = vsyncpa [#allocation12], 0 }
   0xc   :  { %23 = vsyncpa [#allocation12 + $0x1], 0  ;;  %s2397_s18 = smov 0   ;;  %s2399_s19 = smov 0  }
   0xd   :  { %s2401_s20 = smov 0   ;;  %s2403_s21 = smov 0  }
   0xe LB: > { %s2418_s22 = sadd.s32 1, %s2356_s21   ;;  %s57_s23 = sadd.s32 1, %s2352_s20  ;;  %s2356_s21 = sphi %s2403_s21, %s4039_s21   ;;  %s2352_s20 = sphi %s2401_s20, %s4038_s20   ;;  %s2348_s19 = sphi %s2399_s19, %s4037_s19   ;;  %s2344_s18 = sphi %s2397_s18, %s4036_s18  }
   0xf   : > { %s54_s24 = ssub.s32 %s2356_s21, %s2418_s22  ;;  %p64_p0 = scmp.ne.s32.totalorder %s2352_s20, %s2348_s19 }
  0x10   : > { %p55_p1 = scmp.eq.s32.totalorder %s54_s24, 0  ;;  %p65_p2 = scmp.eq.s32.totalorder %s2356_s21, 0 }
  0x11   : > { %p1990_p4 = scmp.lt.s32.totalorder %s2356_s21, 2  ;;  %s210_s26 = sand.u32 1, %s2356_s21  }
  0x12   : > { %s2429_s25 = scalar_select %p55_p1, %s2352_s20, %s57_s23  }
  0x13   : > { %p66_p5 = por %p65_p2, %p64_p0  ;;  %s3885_s27 = sand.u32 1, %s2352_s20  }
  0x14   : > { %3910 = sst [smem:[#allocation18_spill]] %s2429_s25  ;;  %s2438_s28 = sshll.u32 %s3885_s27, 4 }
  0x15   : > { %s2441_s29 = sshll.u32 %s2356_s21, 4  ;;  %s3911_s1 = sld [smem:[#allocation42_spill]] }
  0x16   : > { %s214_s9 = scalar_lea.vmem [#allocation5], %s2438_s28  ;;  %p2450_p6 = pnand %p1990_p4, %p66_p5 }
  0x17   : > { %s222_s10 = sshll.u32 %s214_s9, 4  ;;  %s2454_s12 = scalar_lea.sflag [#allocation6], %s210_s26  ;;  %s223_s10 = int_to_ptr.vmem [resolvable:$true] %s222_s10 }
  0x18   : > { %p2134_p8 = pneg %p2450_p6 }
  0x1b   : > { %s219_s7 = scalar_lea.hbm %s3911_s1, %s2441_s29  ;;  %s2137_s17 = scalar_lea.hbm %s3911_s1, 32 }
  0x1c   : > { %s220_s8 = sshll.u32 %s219_s7, 4  ;;  %s221_s8 = int_to_ptr.hbm [resolvable:$true] %s220_s8 }
  0x1d   : > { %s2130_s13 = sshra.s32 %s221_s8, 4  ;;  %s2131_s13 = int_to_ptr.hbm [resolvable:$true] %s2130_s13 }
  0x1e   : > { %s2132_s14 = scalar_lea.hbm %s2131_s13, 16  ;;  %p2138_p11 = scmp.lt.s32.totalorder %s2131_s13, %s3911_s1 }
  0x1f   : > { %p2133_p7 = scmp.ne.s32.totalorder %s2131_s13, %s2132_s14  ;;  %p2139_p12 = scmp.lt.s32.totalorder %s2137_s17, %s2132_s14 }
  0x21   : > { %p2135_p9 = pnand %p2134_p8, %p2133_p7  ;;  %p2140_p13 = por %p2139_p12, %p2138_p11 }
  0x23   : > { %p2136_p10 = pneg %p2135_p9 }
  0x25   : > { %p2141_p1 = pnand %p2140_p13, %p2136_p10 }
  0x27   : > { %2144 = shalt.err (!%p2141_p1)
}
  0x28   : > { %s3886_s26 = smov 128   ;;  %s3888_s30 = smov 8  }
  0x29   : > { %1975 = dma.hbm_to_vmem [thread:$0]  (!%p2450_p6), %s221_s8, 256, %s223_s10, %s2454_s12, %s3886_s26, %s3886_s26, %s3888_s30  }
  0x2a   : > { %s2474_s6 = sadd.s32 4294967295, %s2356_s21   ;;  %s1755_s7 = sadd.s32 4294967294, %s2356_s21  }
  0x2b   : > { %p70_p2 = scmp.ne.s32.totalorder %s2348_s19, %s2344_s18  ;;  %p3890_p4 = scmp.eq.s32.totalorder %s2474_s6, 0 }
  0x2c   : > { %p146_p5 = scmp.eq.s32.totalorder %s2474_s6, 1  ;;  %p152_p7 = scmp.eq.s32.totalorder %s1755_s7, 1 }
  0x2d   : > { %p2483_p9 = por %p3890_p4, %p70_p2  ;;  %p1756_p10 = scmp.ge.s32.totalorder %s2356_s21, 1 }
  0x2e   : > { %p2491_p11 = por %p146_p5, %p64_p0  ;;  %p2495_p12 = por %p152_p7, %p70_p2 }
  0x2f   : > { %p185_p13 = scmp.lt.s32.totalorder %s2356_s21, 3  ;;  %s3916_s0 = sld [smem:[#allocation41_spill]] }
  0x30   : > { %s2360_s17 = smov [#allocation2]   ;;  %s3918_s2 = sld [smem:[#allocation43_spill]] }
  0x31   : > { %p2503_p1 = pnand %p1756_p10, %p185_p13  ;;  %s199_s23 = sshll.u32 %s2360_s17, 4  ;;  %s200_s23 = int_to_ptr.vmem [resolvable:$true] %s199_s23 }
  0x32   : > { %s236_s26 = scalar_lea.vmem [#allocation7], %s2438_s28 }
  0x33   : > { %p1968_p0 = pneg %p2503_p1  ;;  %s244_s30 = sshll.u32 %s236_s26, 4  ;;  %s245_s30 = int_to_ptr.vmem [resolvable:$true] %s244_s30 }
  0x35   : > { %s197_s15 = sshll.u32 %s3916_s0, 4  ;;  %p1969_p2 = pnand %p1968_p0, %p3890_p4  ;;  %s198_s15 = int_to_ptr.hbm [resolvable:$true] %s197_s15 }
  0x36   : > { %s241_s27 = scalar_lea.hbm %s3918_s2, %s2441_s29  ;;  %s2197_s24 = scalar_lea.hbm %s3918_s2, 32 }
  0x37   : > { %s242_s13 = sshll.u32 %s241_s27, 4  ;;  %s243_s13 = int_to_ptr.hbm [resolvable:$true] %s242_s13 }
  0x38   : > { %1971 = dma.hbm_to_vmem [thread:$0]  (!%p1969_p2), %s198_s15, 16, %s200_s23, [#allocation3]  }
  0x39   : > { %s2190_s14 = sshra.s32 %s243_s13, 4  ;;  %s2191_s14 = int_to_ptr.hbm [resolvable:$true] %s2190_s14 }
  0x3a   : > { %s2192_s0 = scalar_lea.hbm %s2191_s14, 16  ;;  %p2198_p13 = scmp.lt.s32.totalorder %s2191_s14, %s3918_s2 }
  0x3b   : > { %p2193_p5 = scmp.ne.s32.totalorder %s2191_s14, %s2192_s0  ;;  %p2199_p0 = scmp.lt.s32.totalorder %s2197_s24, %s2192_s0 }
  0x3d   : > { %p2195_p7 = pnand %p2193_p5, %p2134_p8  ;;  %p2200_p3 = por %p2199_p0, %p2198_p13 }
  0x3f   : > { %p2196_p10 = pneg %p2195_p7 }
  0x41   : > { %p2201_p4 = pnand %p2200_p3, %p2196_p10 }
  0x43   : > { %2204 = shalt.err (!%p2201_p4)
}
  0x44   : > { %s3919_s27 = smov 8   ;;  %s3920_s15 = smov 128  }
  0x45   : > { %1978 = dma.hbm_to_vmem [thread:$0]  (!%p2450_p6), %s243_s13, 256, %s245_s30, %s2454_s12, %s3920_s15, %s3920_s15, %s3919_s27  }
  0x46   : > { %s263_s17 = scalar_lea.hbm %s3882_s3, %s2441_s29  ;;  %s258_s0 = scalar_lea.vmem [#allocation8], %s2438_s28 }
  0x47   : > { %s264_s14 = sshll.u32 %s263_s17, 4  ;;  %s266_s24 = sshll.u32 %s258_s0, 4  ;;  %s265_s14 = int_to_ptr.hbm [resolvable:$true] %s264_s14  ;;  %s267_s24 = int_to_ptr.vmem [resolvable:$true] %s266_s24 }
  0x48   : > { %s3921_s7 = sand.u32 1, %s2352_s20   ;;  %s2220_s2 = sshra.s32 %s265_s14, 4  ;;  %s2221_s2 = int_to_ptr.hbm [resolvable:$true] %s2220_s2 }
  0x49   : > { %s255_s26 = scalar_lea.sflag [#allocation9], %s3921_s7  ;;  %s2222_s25 = scalar_lea.hbm %s2221_s2, 16 }
  0x4a   : > { %p2223_p3 = scmp.ne.s32.totalorder %s2221_s2, %s2222_s25  ;;  %s2227_s13 = scalar_lea.hbm %s3882_s3, 32 }
  0x4b   : > { %p2228_p5 = scmp.lt.s32.totalorder %s2221_s2, %s3882_s3  ;;  %p2229_p7 = scmp.lt.s32.totalorder %s2227_s13, %s2222_s25 }
  0x4c   : > { %p2225_p4 = pnand %p2223_p3, %p2134_p8 }
  0x4d   : > { %p2230_p10 = por %p2229_p7, %p2228_p5 }
  0x4e   : > { %p2226_p2 = pneg %p2225_p4 }
  0x50   : > { %p2231_p13 = pnand %p2230_p10, %p2226_p2 }
  0x52   : > { %2234 = shalt.err (!%p2231_p13)
}
  0x53   : > { %1981 = dma.hbm_to_vmem [thread:$0]  (!%p2450_p6), %s265_s14, 256, %s267_s24, %s255_s26, %s3920_s15, %s3920_s15, %s3919_s27  }
  0x54   : > { %278 = sbr.rel (%p2503_p1) target bundleno = 1302 (0x516), region = 36 }
  0x59   : > { %p3922_p8 = scmp.eq.s32.totalorder %s2474_s6, 0 }
  0x5b   : > { %2323 = dma.done.wait (%p3922_p8), [#allocation3], 16   ;;  %p3923_p0 = pmov %p3922_p8 }
  0x5c   : > { %s285_s2 = sand.u32 1, %s2474_s6   ;;  %s2560_s25 = sand.u32 1, %s2348_s19  }
  0x5d   : > { %2325 = vsyncadd (%p3923_p0), [#allocation3], 4294967280  ;;  %s2563_s28 = sshll.u32 %s2560_s25, 4  ;;  %s286_s11 = scalar_lea.sflag [#allocation6], %s285_s2 }
  0x5e   : > { %s289_s27 = scalar_lea.vmem [#allocation5], %s2563_s28 }
  0x5f   : > { %2327 = dma.done.wait (%p2483_p9), %s286_s11, 512  }
  0x60   : > { %2329 = vsyncadd (%p2483_p9), %s286_s11, 4294966784  ;;  %s299_s16 = scalar_lea.vmem [#allocation7], %s2563_s28  ;;  %s306_s15 = scalar_lea.sflag [#allocation9], %s2560_s25 }
  0x61   : > { %s309_s23 = scalar_lea.vmem [#allocation8], %s2563_s28 }
  0x62   : > { %2331 = dma.done.wait (%p2483_p9), %s306_s15, 256  }
  0x63   : > { %2333 = vsyncadd (%p2483_p9), %s306_s15, 4294967040  ;;  %v3892_v0 = vlaneseq  ;;  %v816_v4 = vld [vmem:[%s289_s27 + $0x8] sm:$0xff]  ;;  %v815_v6 = vld [vmem:[%s289_s27] sm:$0xff]  ;;  %vm423_vm0 = vcmask 130048   ;;  %v2361_v15 = vmov 0.0   ;;  %s1597_s14 = scalar_lea.hbm %s3884_s5, %s2474_s6  ;;  %s350_s0 = scalar_lea.vmem [#allocation11], %s2560_s25 }
  0x64   : > { %v818_v5 = vld [vmem:[%s299_s16 + $0x8] sm:$0xff]  ;;  %1898 = vmatpush.msra.mxu3 %v816_v4  ;;  %v817_v8 = vld [vmem:[%s299_s16] sm:$0xff]  ;;  %835 = vmatpush.msra.mxu1 %v816_v4  ;;  %s1599_s24 = sshll.u32 %s350_s0, 4  ;;  %s1601_s7 = sshll.u32 %s1597_s14, 4  ;;  %s1600_s24 = int_to_ptr.vmem [resolvable:$true] %s1599_s24  ;;  %s1602_s7 = int_to_ptr.hbm [resolvable:$true] %s1601_s7 }
  0x65   : > { %v2578_v1 = vshrl.u32 %v3892_v0, 7  ;;  %916 = vmatpush.msra.mxu2 %v818_v5  ;;  %v2589_v9 = vld [vmem:[#allocation2] ss:$0 sm:$0xff]  ;;  %v819_v45 = vld [vmem:[%s309_s23] sm:$0xff]  ;;  %s1572_s26 = scalar_lea.sflag [#allocation12], %s2560_s25  ;;  %s2264_s12 = sshra.s32 %s1602_s7, 4  ;;  %s2265_s12 = int_to_ptr.hbm [resolvable:$true] %s2264_s12 }
  0x66   : > { %1899 = vmatpush.msra.mxu3 %v815_v6  ;;  %836 = vmatpush.msra.mxu1 %v815_v6  ;;  %v820_v44 = vld [vmem:[%s309_s23 + $0x8] sm:$0xff]  ;;  %s2266_s30 = scalar_lea.hbm %s2265_s12, 1  ;;  %s2270_s1 = scalar_lea.hbm %s3884_s5, 2 }
  0x67   : > { %3924 = vst [vmem:[#allocation19_spill] sm:$0xff] %v2578_v1  ;;  %v2581_v2 = vadd.s32 72, %v2578_v1  ;;  %v2584_v3 = vadd.s32 120, %v2578_v1  ;;  %v2587_v7 = vadd.s32 104, %v2578_v1  ;;  %v2592_v10 = vadd.s32 88, %v2578_v1  ;;  %917 = vmatpush.msra.mxu2 %v817_v8  ;;  %p2267_p6 = scmp.ne.s32.totalorder %s2265_s12, %s2266_s30  ;;  %p2271_p3 = scmp.lt.s32.totalorder %s2265_s12, %s3884_s5 }
  0x68   : > { %v2595_v11 = vadd.s32 80, %v2578_v1  ;;  %v2598_v12 = vadd.s32 8, %v2578_v1  ;;  %v2601_v13 = vadd.s32 112, %v2578_v1  ;;  %vm3891_vm2 = vcmp.eq.s32.totalorder %v2589_v9, %v2578_v1  ;;  %997 = vmatpush.msrb.mxu3 %v820_v44  ;;  %p2272_p4 = scmp.lt.s32.totalorder %s2270_s1, %s2266_s30 }
  0x69   : > { %vm3901_vm1 = vcmp.eq.s32.totalorder %v2589_v9, %v2581_v2  ;;  %vm390_vm3 = vcmp.eq.s32.totalorder %v2589_v9, %v2584_v3  ;;  %v2610_v14 = vadd.s32 96, %v2578_v1  ;;  %v2622_v17 = vsel %vm3891_vm2, 1.0, %v2361_v15  ;;  %p2268_p9 = pnand %p2267_p6, %p2491_p11 }
  0x6a   : > { %3925 = vst [vmem:[#allocation20_spill] sm:$0xff] %v2598_v12  ;;  %v2616_v16 = vsel %vm3901_vm1, 1.0, %v2361_v15  ;;  %v2628_v18 = vsel %vm390_vm3, 1.0, %v2361_v15  ;;  %vm388_vm4 = vcmp.eq.s32.totalorder %v2589_v9, %v2587_v7  ;;  %1824 = vmatmul.msk.f32.vlgmr.msra.gmra.mxu2 %vm423_vm0, %v2622_v17  ;;  %vm3906_vm5 = vcmp.eq.s32.totalorder %v2589_v9, %v2592_v10  ;;  %1808 = vmatmul.msk.f32.vlgmr.msra.gmra.mxu1 %vm423_vm0, %v2622_v17  ;;  %p2273_p2 = por %p2272_p4, %p2271_p3 }
  0x6b   : > { %1817 = vmatmul.msk.f32.vlgmr.msra.gmra.mxu3 %vm423_vm0, %v2616_v16  ;;  %v469_v19 = vsel %vm423_vm0, %v2628_v18, 0.0  ;;  %v2642_v20 = vsel %vm388_vm4, 1.0, %v2361_v15  ;;  %v2652_v22 = vsel %vm3906_vm5, 1.0, %v2361_v15  ;;  %vm3904_vm6 = vcmp.eq.s32.totalorder %v2589_v9, %v2595_v11  ;;  %1791 = vmatpush.xpose.msk.msra.mxu0 %vm423_vm0, %v2628_v18  ;;  %p2269_p1 = pneg %p2268_p9 }
  0x6c   : > { %470 = vadd.xlane.f32.xlu0 %v469_v19  ;;  %v463_v21 = vsel %vm423_vm0, %v2642_v20, 0.0  ;;  %v457_v23 = vsel %vm423_vm0, %v2652_v22, 0.0  ;;  %vm3893_vm7 = vcmp.eq.s32.totalorder %v2589_v9, %v2598_v12  ;;  %vm389_vm8 = vcmp.eq.s32.totalorder %v2589_v9, %v2601_v13  ;;  %998 = vmatpush.msrb.mxu3 %v819_v45 }
  0x6d   : > { %464 = vadd.xlane.f32.xlu1 %v463_v21  ;;  %vm387_vm9 = vcmp.eq.s32.totalorder %v2589_v9, %v2610_v14  ;;  %458 = vadd.xlane.f32.xlu2 %v457_v23  ;;  %v2672_v24 = vsel %vm389_vm8, 1.0, %v2361_v15  ;;  %v2684_v26 = vsel %vm3904_vm6, 1.0, %v2361_v15  ;;  %v2690_v27 = vsel %vm3893_vm7, 1.0, %v2361_v15  ;;  %p2274_p5 = pnand %p2273_p2, %p2269_p1 }
  0x6e   : > { %v2678_v25 = vsel %vm387_vm9, 1.0, %v2361_v15  ;;  %v2693_v28 = vadd.s32 64, %v2578_v1  ;;  %v466_v29 = vsel %vm423_vm0, %v2672_v24, 0.0  ;;  %v2698_v30 = vadd.s32 16, %v2578_v1 }
  0x6f   : > { %v2701_v31 = vadd.s32 56, %v2578_v1  ;;  %1792 = vmatpush.xpose.msk.msra.mxu0 %vm423_vm0, %v2672_v24  ;;  %v460_v32 = vsel %vm423_vm0, %v2678_v25, 0.0  ;;  %v454_v33 = vsel %vm423_vm0, %v2684_v26, 0.0  ;;  %v2730_v35 = vadd.s32 48, %v2578_v1 }
  0x70   : > { %3926 = vst [vmem:[#allocation21_spill] sm:$0xff] %v2698_v30  ;;  %vm3900_vm10 = vcmp.eq.s32.totalorder %v2589_v9, %v2693_v28  ;;  %vm3894_vm11 = vcmp.eq.s32.totalorder %v2589_v9, %v2698_v30  ;;  %v2745_v38 = vadd.s32 40, %v2578_v1  ;;  %v451_v39 = vsel %vm423_vm0, %v2616_v16, 0.0 }
  0x71   : > { %vm3899_vm12 = vcmp.eq.s32.totalorder %v2589_v9, %v2701_v31  ;;  %v2727_v34 = vsel %vm3900_vm10, 1.0, %v2361_v15  ;;  %v2736_v36 = vsel %vm3894_vm11, 1.0, %v2361_v15  ;;  %v2750_v40 = vadd.s32 24, %v2578_v1 }
  0x72   : > { %1825 = vmatmul.msk.f32.gmra.mxu2 %vm423_vm0, %v2690_v27  ;;  %1809 = vmatmul.msk.f32.gmra.mxu1 %vm423_vm0, %v2690_v27  ;;  %v2742_v37 = vsel %vm3899_vm12, 1.0, %v2361_v15  ;;  %v2753_v41 = vadd.s32 32, %v2578_v1  ;;  %v448_v42 = vsel %vm423_vm0, %v2727_v34, 0.0  ;;  %vm3898_vm13 = vcmp.eq.s32.totalorder %v2589_v9, %v2730_v35 }
  0x73   : > { %1818 = vmatmul.msk.f32.gmra.mxu3 %vm423_vm0, %v2684_v26  ;;  %1793 = vmatpush.xpose.msk.msra.mxu0 %vm423_vm0, %v2642_v20  ;;  %v445_v43 = vsel %vm423_vm0, %v2742_v37, 0.0  ;;  %vm3897_vm14 = vcmp.eq.s32.totalorder %v2589_v9, %v2745_v38  ;;  %vm3895_vm15 = vcmp.eq.s32.totalorder %v2589_v9, %v2750_v40  ;;  %v1781_v46 = vsel %vm3898_vm13, 1.0, %v2361_v15 }
  0x74   : > { %467 = vadd.xlane.f32.xlu0 %v466_v29  ;;  %vm3896_vm2 = vcmp.eq.s32.totalorder %v2589_v9, %v2753_v41  ;;  %v1780_v47 = vsel %vm3897_vm14, 1.0, %v2361_v15  ;;  %v1778_v48 = vsel %vm3895_vm15, 1.0, %v2361_v15  ;;  %v442_v50 = vsel %vm423_vm0, %v1781_v46, 0.0 }
  0x75   : > { %461 = vadd.xlane.f32.xlu1 %v460_v32  ;;  %455 = vadd.xlane.f32.xlu2 %v454_v33  ;;  %v1779_v49 = vsel %vm3896_vm2, 1.0, %v2361_v15  ;;  %v439_v51 = vsel %vm423_vm0, %v1780_v47, 0.0  ;;  %v433_v53 = vsel %vm423_vm0, %v1778_v48, 0.0  ;;  %v430_v54 = vsel %vm423_vm0, %v2736_v36, 0.0 }
  0x76   : > { %v436_v52 = vsel %vm423_vm0, %v1779_v49, 0.0  ;;  %v427_v55 = vsel %vm423_vm0, %v2690_v27, 0.0  ;;  %v424_v56 = vsel %vm423_vm0, %v2622_v17, 0.0 }
  0x77   : > { %1794 = vmatpush.xpose.msk.msra.mxu0 %vm423_vm0, %v2678_v25 }
  0x7a   : > { %1826 = vmatmul.msk.f32.gmra.mxu2 %vm423_vm0, %v2736_v36  ;;  %1810 = vmatmul.msk.f32.gmra.mxu1 %vm423_vm0, %v2736_v36 }
  0x7b   : > { %1819 = vmatmul.msk.f32.gmra.mxu3 %vm423_vm0, %v2652_v22  ;;  %1795 = vmatpush.xpose.msk.msra.mxu0 %vm423_vm0, %v2652_v22 }
  0x7c   : > { %452 = vadd.xlane.f32.xlu0 %v451_v39 }
  0x7d   : > { %449 = vadd.xlane.f32.xlu1 %v448_v42  ;;  %446 = vadd.xlane.f32.xlu2 %v445_v43 }
  0x7f   : > { %1796 = vmatpush.xpose.msk.msra.mxu0 %vm423_vm0, %v2684_v26 }
  0x82   : > { %1827 = vmatmul.msk.f32.gmra.mxu2 %vm423_vm0, %v1778_v48  ;;  %1811 = vmatmul.msk.f32.gmra.mxu1 %vm423_vm0, %v1778_v48 }
  0x83   : > { %1820 = vmatmul.msk.f32.gmra.mxu3 %vm423_vm0, %v2678_v25  ;;  %1797 = vmatpush.xpose.msk.msra.mxu0 %vm423_vm0, %v2616_v16 }
  0x84   : > { %443 = vadd.xlane.f32.xlu0 %v442_v50 }
  0x85   : > { %440 = vadd.xlane.f32.xlu1 %v439_v51  ;;  %437 = vadd.xlane.f32.xlu2 %v436_v52 }
  0x87   : > { %1798 = vmatpush.xpose.msk.msra.mxu0 %vm423_vm0, %v2727_v34 }
  0x8a   : > { %1828 = vmatmul.msk.f32.gmra.mxu2 %vm423_vm0, %v1779_v49  ;;  %1812 = vmatmul.msk.f32.gmra.mxu1 %vm423_vm0, %v1779_v49 }
  0x8b   : > { %1821 = vmatmul.msk.f32.gmra.mxu3 %vm423_vm0, %v2642_v20  ;;  %1799 = vmatpush.xpose.msk.msra.mxu0 %vm423_vm0, %v2742_v37 }
  0x8c   : > { %434 = vadd.xlane.f32.xlu0 %v433_v53 }
  0x8d   : > { %431 = vadd.xlane.f32.xlu1 %v430_v54  ;;  %428 = vadd.xlane.f32.xlu2 %v427_v55 }
  0x8f   : > { %1800 = vmatpush.xpose.msk.msra.mxu0 %vm423_vm0, %v1781_v46 }
  0x92   : > { %1829 = vmatmul.msk.f32.gmra.mxu2 %vm423_vm0, %v1780_v47  ;;  %1813 = vmatmul.msk.f32.gmra.mxu1 %vm423_vm0, %v1780_v47 }
  0x93   : > { %1822 = vmatmul.msk.f32.gmra.mxu3 %vm423_vm0, %v2672_v24  ;;  %1801 = vmatpush.xpose.msk.msra.mxu0 %vm423_vm0, %v1780_v47 }
  0x94   : > { %425 = vadd.xlane.f32.xlu0 %v424_v56 }
  0x97   : > { %1802 = vmatpush.xpose.msk.msra.mxu0 %vm423_vm0, %v1779_v49 }
  0x9a   : > { %1830 = vmatmul.msk.f32.gmra.mxu2 %vm423_vm0, %v1781_v46  ;;  %1814 = vmatmul.msk.f32.gmra.mxu1 %vm423_vm0, %v1781_v46 }
  0x9b   : > { %1823 = vmatmul.msk.f32.gmra.mxu3 %vm423_vm0, %v2628_v18  ;;  %1803 = vmatpush.xpose.msk.msra.mxu0 %vm423_vm0, %v1778_v48 }
  0x9f   : > { %1804 = vmatpush.xpose.msk.msra.mxu0 %vm423_vm0, %v2736_v36 }
  0xa2   : > { %1831 = vmatmul.msk.f32.gmra.mxu2 %vm423_vm0, %v2742_v37  ;;  %1815 = vmatmul.msk.f32.gmra.mxu1 %vm423_vm0, %v2742_v37 }
  0xa3   : > { %1840 = vmatmul.msk.f32.vlgmr.msrb.gmra.mxu3 %vm423_vm0, %v2622_v17  ;;  %1805 = vmatpush.xpose.msk.msra.mxu0 %vm423_vm0, %v2690_v27 }
  0xa7   : > { %1806 = vmatpush.xpose.msk.msra.mxu0 %vm423_vm0, %v2622_v17 }
  0xaa   : > { %1832 = vmatmul.msk.f32.gmra.mxu2 %vm423_vm0, %v2727_v34  ;;  %1816 = vmatmul.msk.f32.gmra.mxu1 %vm423_vm0, %v2727_v34 }
  0xab   : > { %1841 = vmatmul.msk.f32.gmra.mxu3 %vm423_vm0, %v2690_v27 }
  0xb2   : > { %1833 = vmatmul.msk.f32.gmra.mxu2 %vm423_vm0, %v2616_v16 }
  0xb3   : > { %1842 = vmatmul.msk.f32.gmra.mxu3 %vm423_vm0, %v2736_v36 }
  0xba   : > { %1834 = vmatmul.msk.f32.gmra.mxu2 %vm423_vm0, %v2684_v26 }
  0xbb   : > { %1843 = vmatmul.msk.f32.gmra.mxu3 %vm423_vm0, %v1778_v48 }
  0xc2   : > { %1835 = vmatmul.msk.f32.gmra.mxu2 %vm423_vm0, %v2652_v22 }
  0xc3   : > { %1844 = vmatmul.msk.f32.gmra.mxu3 %vm423_vm0, %v1779_v49 }
  0xca   : > { %1836 = vmatmul.msk.f32.gmra.mxu2 %vm423_vm0, %v2678_v25 }
  0xcb   : > { %1845 = vmatmul.msk.f32.gmra.mxu3 %vm423_vm0, %v1780_v47 }
  0xd2   : > { %1837 = vmatmul.msk.f32.gmra.mxu2 %vm423_vm0, %v2642_v20 }
  0xd3   : > { %1846 = vmatmul.msk.f32.gmra.mxu3 %vm423_vm0, %v1781_v46 }
  0xda   : > { %1838 = vmatmul.msk.f32.gmra.mxu2 %vm423_vm0, %v2672_v24 }
  0xdb   : > { %1847 = vmatmul.msk.f32.gmra.mxu3 %vm423_vm0, %v2742_v37 }
  0xe0   : > { %v2937_v27 = vpop.xlane.xlu1 %464  ;;  %v2950_v36 = vpop.xlane.xlu2 %458 }
  0xe1   : > { %vm658_vm2 = vweird.f32 %v2950_v36 }
  0xe2   : > { %1839 = vmatmul.msk.f32.gmra.mxu2 %vm423_vm0, %v2628_v18 }
  0xe3   : > { %1848 = vmatmul.msk.f32.gmra.mxu3 %vm423_vm0, %v2727_v34 }
  0xe8   : > { %v2957_v42 = vpop.xlane.xlu1 %461  ;;  %v2978_v53 = vpop.xlane.xlu2 %455 }
  0xeb   : > { %1849 = vmatmul.msk.f32.gmra.mxu3 %vm423_vm0, %v2616_v16 }
  0xed   : > { %v2881_v58 = vpop.f32.mrf.mxu2 }
  0xee   : > { %v2879_v57 = vpop.f32.mrf.mxu3  ;;  %3928 = vst [vmem:[#allocation23_spill] sm:$0xff] %v2881_v58 }
  0xef   : > { %3927 = vst [vmem:[#allocation22_spill] sm:$0xff] %v2879_v57 }
  0xf3   : > { %1850 = vmatmul.msk.f32.gmra.mxu3 %vm423_vm0, %v2684_v26 }
  0xf5   : > { %v2887_v60 = vpop.f32.mrf.mxu2 }
  0xf6   : > { %v2885_v59 = vpop.f32.mrf.mxu3  ;;  %3930 = vst [vmem:[#allocation25_spill] sm:$0xff] %v2887_v60 }
  0xf7   : > { %3929 = vst [vmem:[#allocation24_spill] sm:$0xff] %v2885_v59  ;;  %v692_v59 = vand.u32 2147483647, %v2937_v27 }
  0xfb   : > { %1851 = vmatmul.msk.f32.gmra.mxu3 %vm423_vm0, %v2652_v22 }
  0xfd   : > { %v2893_v62 = vpop.f32.mrf.mxu2 }
  0xfe   : > { %v2891_v61 = vpop.f32.mrf.mxu3  ;;  %3932 = vst [vmem:[#allocation27_spill] sm:$0xff] %v2893_v62 }
  0xff   : > { %3931 = vst [vmem:[#allocation26_spill] sm:$0xff] %v2891_v61 }
 0x103   : > { %1852 = vmatmul.msk.f32.gmra.mxu3 %vm423_vm0, %v2678_v25 }
 0x105   : > { %v2899_v4 = vpop.f32.mrf.mxu2 }
 0x106   : > { %v2897_v63 = vpop.f32.mrf.mxu3 }
 0x107   : > { %3933 = vst [vmem:[#allocation28_spill] sm:$0xff] %v2897_v63 }
 0x10b   : > { %1853 = vmatmul.msk.f32.gmra.mxu3 %vm423_vm0, %v2642_v20 }
 0x10d   : > { %v2905_v6 = vpop.f32.mrf.mxu2 }
 0x10e   : > { %v2903_v5 = vpop.f32.mrf.mxu3 }
 0x10f   : > { %3934 = vst [vmem:[#allocation29_spill] sm:$0xff] %v2903_v5 }
 0x113   : > { %1854 = vmatmul.msk.f32.gmra.mxu3 %vm423_vm0, %v2672_v24 }
 0x115   : > { %v2911_v15 = vpop.f32.mrf.mxu2 }
 0x116   : > { %v2909_v8 = vpop.f32.mrf.mxu3 }
 0x117   : > { %3935 = vst [vmem:[#allocation30_spill] sm:$0xff] %v2909_v8 }
 0x11b   : > { %1855 = vmatmul.msk.f32.gmra.mxu3 %vm423_vm0, %v2628_v18  ;;  %v2935_v18 = vpop.xlane.xlu0 %470 }
 0x11c   : > { %2034 = vrcp.f32 %v2935_v18  ;;  %vm718_vm7 = vweird.f32 %v2935_v18  ;;  %v722_v5 = vand.u32 2147483647, %v2935_v18 }
 0x11d   : > { %v2917_v17 = vpop.f32.mrf.mxu2 }
 0x11e   : > { %v2915_v16 = vpop.f32.mrf.mxu3  ;;  %vm3023_vm10 = vcmp.eq.f32.partialorder %v722_v5, 8.507059e+37  ;;  %v677_v5 = vand.u32 2147483647, %v2957_v42 }
 0x11f   : > { %3936 = vst [vmem:[#allocation31_spill] sm:$0xff] %v2915_v16  ;;  %v724_v16 = vand.u32 2147483648, %v2935_v18 }
 0x122   : > { %v2947_v34 = vpop.eup %2034 }
 0x123   : > { %v2944_v33 = vpop.xlane.xlu0 %467  ;;  %v714_v43 = vmul.f32 %v2947_v34, %v2935_v18  ;;  %vm719_vm11 = vweird.f32 %v2947_v34 }
 0x124   : > { %2036 = vrcp.f32 %v2944_v33  ;;  %vm2999_vm15 = vmor %vm718_vm7, %vm719_vm11  ;;  %vm703_vm13 = vweird.f32 %v2944_v33  ;;  %vm688_vm7 = vweird.f32 %v2937_v27  ;;  %vm486_vm5 = vcmp.gt.f32.partialorder %v2944_v33, 0.0 }
 0x125   : > { %v2919_v19 = vpop.f32.mrf.mxu2  ;;  %2038 = vrcp.f32 %v2937_v27  ;;  %v715_v46 = vsub.f32 1.0, %v714_v43 }
 0x126   : > { %v2921_v20 = vpop.f32.mrf.mxu3  ;;  %2040 = vrcp.f32 %v2950_v36 }
 0x127   : > { %3937 = vst [vmem:[#allocation32_spill] sm:$0xff] %v2921_v20  ;;  %2042 = vrcp.f32 %v2957_v42  ;;  %v716_v55 = vmul.f32 %v2947_v34, %v715_v46 }
 0x128   : > { %2044 = vrcp.f32 %v2978_v53 }
 0x129   : > { %v717_v46 = vadd.f32 %v2947_v34, %v716_v55 }
 0x12a   : > { %v2962_v44 = vpop.eup %2036 }
 0x12b   : > { %v2964_v45 = vpop.eup %2038  ;;  %v699_v47 = vmul.f32 %v2962_v44, %v2944_v33  ;;  %v2988_v57 = vpop.xlane.xlu0 %452  ;;  %vm704_vm12 = vweird.f32 %v2962_v44 }
 0x12c   : > { %v2968_v48 = vpop.eup %2040  ;;  %v684_v50 = vmul.f32 %v2964_v45, %v2937_v27  ;;  %2046 = vrcp.f32 %v2988_v57  ;;  %vm689_vm11 = vweird.f32 %v2964_v45  ;;  %vm3036_vm1 = vmor %vm703_vm13, %vm704_vm12  ;;  %vm487_vm13 = vcmp.gt.f32.partialorder %v2935_v18, 0.0 }
 0x12d   : > { %v2923_v21 = vpop.f32.mrf.mxu2  ;;  %v2970_v49 = vpop.eup %2042  ;;  %v700_v54 = vsub.f32 1.0, %v699_v47  ;;  %v654_v56 = vmul.f32 %v2968_v48, %v2950_v36  ;;  %vm659_vm14 = vweird.f32 %v2968_v48  ;;  %v725_v47 = vor.u32 1.1754944e-38, %v724_v16  ;;  %vm3053_vm12 = vmor %vm688_vm7, %vm689_vm11 }
 0x12e   : > { %v2925_v22 = vpop.f32.mrf.mxu3  ;;  %v669_v43 = vmul.f32 %v2970_v49, %v2957_v42  ;;  %v685_v0 = vsub.f32 1.0, %v684_v50  ;;  %v2996_v50 = vpop.xlane.xlu1 %449  ;;  %v694_v16 = vand.u32 2147483648, %v2937_v27  ;;  %vm674_vm6 = vweird.f32 %v2970_v49 }
 0x12f   : > { %3938 = vst [vmem:[#allocation33_spill] sm:$0xff] %v2925_v22  ;;  %v701_v8 = vmul.f32 %v2962_v44, %v700_v54  ;;  %v655_v20 = vsub.f32 1.0, %v654_v56  ;;  %v3003_v63 = vpop.eup %2044  ;;  %2048 = vrcp.f32 %v2996_v50  ;;  %vm3070_vm11 = vcmp.eq.f32.partialorder %v692_v59, 8.507059e+37 }
 0x130   : > { %v670_v22 = vsub.f32 1.0, %v669_v43  ;;  %v686_v54 = vmul.f32 %v2964_v45, %v685_v0  ;;  %v709_v43 = vand.u32 2147483648, %v2944_v33  ;;  %v721_v0 = vsel %vm2999_vm15, %v2947_v34, %v717_v46  ;;  %v3046_v46 = vpop.xlane.xlu2 %446 }
 0x131   : > { %vm673_vm15 = vweird.f32 %v2957_v42  ;;  %v656_v58 = vmul.f32 %v2968_v48, %v655_v20  ;;  %2050 = vrcp.f32 %v3046_v46 }
 0x132   : > { %v671_v61 = vmul.f32 %v2970_v49, %v670_v22  ;;  %v687_v22 = vadd.f32 %v2964_v45, %v686_v54  ;;  %v3044_v34 = vpop.eup %2046  ;;  %v710_v1 = vor.u32 1.1754944e-38, %v709_v43  ;;  %v726_v54 = vsel %vm3023_vm10, %v725_v47, %v721_v0  ;;  %vm3088_vm10 = vmor %vm673_vm15, %vm674_vm6 }
 0x133   : > { %v3067_v30 = vpop.xlane.xlu0 %443  ;;  %v624_v47 = vmul.f32 %v3044_v34, %v2988_v57  ;;  %vm3108_vm6 = vmor %vm658_vm2, %vm659_vm14  ;;  %vm485_vm15 = vcmp.gt.f32.partialorder %v2937_v27, 0.0  ;;  %vm643_vm2 = vweird.f32 %v2978_v53  ;;  %vm644_vm14 = vweird.f32 %v3003_v63 }
 0x134   : > { %v672_v43 = vadd.f32 %v2970_v49, %v671_v61  ;;  %v691_v0 = vsel %vm3053_vm12, %v2964_v45, %v687_v22  ;;  %2052 = vrcp.f32 %v3067_v30  ;;  %vm3095_vm12 = vcmp.eq.f32.partialorder %v677_v5, 8.507059e+37 }
 0x135   : > { %v2927_v23 = vpop.f32.mrf.mxu2  ;;  %v3060_v12 = vpop.eup %2048 }
 0x136   : > { %v2929_v24 = vpop.f32.mrf.mxu3  ;;  %v609_v22 = vmul.f32 %v3060_v12, %v2996_v50  ;;  %v676_v5 = vsel %vm3088_vm10, %v2970_v49, %v672_v43  ;;  %v3962_v49 = vand.u32 2147483647, %v2950_v36  ;;  %vm628_vm10 = vweird.f32 %v2988_v57 }
 0x137   : > { %3939 = vst [vmem:[#allocation34_spill] sm:$0xff] %v2929_v24  ;;  %v664_v24 = vand.u32 2147483648, %v2950_v36 }
 0x138   : > { %v3151_v59 = vpop.xlane.xlu2 %437  ;;  %v610_v27 = vsub.f32 1.0, %v609_v22 }
 0x139   : > { %v665_v45 = vor.u32 1.1754944e-38, %v664_v24  ;;  %v625_v24 = vsub.f32 1.0, %v624_v47  ;;  %v559_v13 = vand.u32 2147483648, %v3151_v59 }
 0x13d   : > { %v2931_v25 = vpop.f32.mrf.mxu2 }
 0x13e   : > { %v2933_v26 = vpop.f32.mrf.mxu3 }
 0x13f   : > { %3940 = vst [vmem:[#allocation35_spill] sm:$0xff] %v2933_v26  ;;  %v679_v26 = vand.u32 2147483648, %v2957_v42 }
 0x145   : > { %v2939_v29 = vpop.f32.mrf.mxu2 }
 0x146   : > { %v2941_v32 = vpop.f32.mrf.mxu3 }
 0x147   : > { %3941 = vst [vmem:[#allocation36_spill] sm:$0xff] %v2941_v32  ;;  %v702_v32 = vadd.f32 %v2962_v44, %v701_v8  ;;  %v3079_v8 = vsel %vm487_vm13, %v726_v54, 0.0  ;;  %vm3138_vm13 = vcmp.eq.f32.partialorder %v3962_v49, 8.507059e+37 }
 0x149   : > { %v706_v20 = vsel %vm3036_vm1, %v2962_v44, %v702_v32  ;;  %vm1064_vm1 = vcmask 261120   ;;  %v657_v44 = vadd.f32 %v2968_v48, %v656_v58 }
 0x14b   : > { %v661_v47 = vsel %vm3108_vm6, %v2968_v48, %v657_v44 }
 0x14d   : > { %v2952_v37 = vpop.f32.mrf.mxu2 }
 0x14e   : > { %v2954_v39 = vpop.f32.mrf.mxu3 }
 0x14f   : > { %3942 = vst [vmem:[#allocation37_spill] sm:$0xff] %v2954_v39  ;;  %v707_v39 = vand.u32 2147483647, %v2944_v33 }
 0x151   : > { %vm708_vm7 = vcmp.eq.f32.partialorder %v707_v39, 8.507059e+37 }
 0x152   : > { %v711_v60 = vsel %vm708_vm7, %v710_v1, %v706_v20  ;;  %v649_v20 = vand.u32 2147483648, %v2978_v53  ;;  %vm3162_vm7 = vmor %vm643_vm2, %vm644_vm14  ;;  %vm613_vm14 = vweird.f32 %v2996_v50 }
 0x155   : > { %v2974_v51 = vpop.f32.mrf.mxu2 }
 0x156   : > { %v2976_v52 = vpop.f32.mrf.mxu3 }
 0x157   : > { %3943 = vst [vmem:[#allocation38_spill] sm:$0xff] %v2976_v52  ;;  %v695_v52 = vor.u32 1.1754944e-38, %v694_v16  ;;  %v680_v16 = vor.u32 1.1754944e-38, %v679_v26  ;;  %v3125_v26 = vsel %vm486_vm5, %v711_v60, 0.0  ;;  %vm484_vm5 = vcmp.gt.f32.partialorder %v2957_v42, 0.0 }
 0x158   : > { %v611_v42 = vmul.f32 %v3060_v12, %v610_v27  ;;  %v619_v27 = vand.u32 2147483648, %v2996_v50 }
 0x159   : > { %v696_v58 = vsel %vm3070_vm11, %v695_v52, %v691_v0  ;;  %v647_v52 = vand.u32 2147483647, %v2978_v53  ;;  %v681_v48 = vsel %vm3095_vm12, %v680_v16, %v676_v5  ;;  %vm483_vm11 = vcmp.gt.f32.partialorder %v2950_v36, 0.0 }
 0x15a   : > { %v3144_v43 = vsel %vm485_vm15, %v696_v58, 0.0  ;;  %v666_v16 = vsel %vm3138_vm13, %v665_v45, %v661_v47  ;;  %v3179_v58 = vpop.xlane.xlu0 %434  ;;  %vm629_vm12 = vweird.f32 %v3044_v34  ;;  %v634_v45 = vand.u32 2147483648, %v2988_v57 }
 0x15b   : > { %v980_v22 = vmul.f32 %v2974_v51, %v3144_v43  ;;  %vm648_vm6 = vcmp.eq.f32.partialorder %v647_v52, 8.507059e+37  ;;  %vm482_vm15 = vcmp.gt.f32.partialorder %v2978_v53, 0.0  ;;  %vm3206_vm2 = vmor %vm628_vm10, %vm629_vm12  ;;  %vm614_vm13 = vweird.f32 %v3060_v12 }
 0x15c   : > { %v635_v60 = vor.u32 1.1754944e-38, %v634_v45  ;;  %vm598_vm10 = vweird.f32 %v3046_v46  ;;  %v542_v14 = vand.u32 2147483647, %v3179_v58 }
 0x15d   : > { %v3011_v55 = vpop.f32.mrf.mxu2 }
 0x15e   : > { %v3013_v56 = vpop.f32.mrf.mxu3  ;;  %v981_v18 = vmul.f32 %v3011_v55, %v3125_v26 }
 0x15f   : > { %3946 = vst [vmem:[#allocation39_spill] sm:$0xff] %v3013_v56  ;;  %v639_v56 = vmul.f32 %v3003_v63, %v2978_v53  ;;  %v3250_v53 = vpop.xlane.xlu2 %428 }
 0x161   : > { %v640_v62 = vsub.f32 1.0, %v639_v56  ;;  %v650_v56 = vor.u32 1.1754944e-38, %v649_v20 }
 0x163   : > { %v641_v54 = vmul.f32 %v3003_v63, %v640_v62  ;;  %v3117_v62 = vpop.eup %2050 }
 0x164   : > { %v3146_v0 = vpop.eup %2052  ;;  %v594_v55 = vmul.f32 %v3117_v62, %v3046_v46  ;;  %vm599_vm12 = vweird.f32 %v3117_v62 }
 0x165   : > { %v964_v32 = vpop.f32.mrf.mxu2  ;;  %v579_v1 = vmul.f32 %v3146_v0, %v3067_v30 }
 0x166   : > { %v3081_v39 = vpop.f32.mrf.mxu3  ;;  %v982_v61 = vmul.f32 %v964_v32, %v3079_v8  ;;  %v642_v32 = vadd.f32 %v3003_v63, %v641_v54  ;;  %v595_v5 = vsub.f32 1.0, %v594_v55 }
 0x167   : > { %3955 = vst [vmem:[#allocation40_spill] sm:$0xff] %v3081_v39  ;;  %v3102_v39 = vpop.xlane.xlu1 %440 }
 0x168   : > { %1856 = vmatpush.xpose.msk.msrb.mxu0 %vm1064_vm1, %v982_v61  ;;  %1900 = vmatpush.xpose.msk.msra.mxu2 %vm1064_vm1, %v982_v61  ;;  %2054 = vrcp.f32 %v3102_v39  ;;  %v626_v61 = vmul.f32 %v3044_v34, %v625_v24  ;;  %v3183_v24 = vsel %vm484_vm5, %v681_v48, 0.0  ;;  %v646_v51 = vsel %vm3162_vm7, %v3003_v63, %v642_v32  ;;  %vm3243_vm7 = vmor %vm613_vm14, %vm614_vm13 }
 0x169   : > { %2056 = vrcp.f32 %v3151_v59  ;;  %v3201_v63 = vsel %vm483_vm11, %v666_v16, 0.0  ;;  %v979_v49 = vmul.f32 %v2952_v37, %v3183_v24  ;;  %v651_v55 = vsel %vm648_vm6, %v650_v56, %v646_v51 }
 0x16a   : > { %v627_v20 = vadd.f32 %v3044_v34, %v626_v61  ;;  %2058 = vrcp.f32 %v3179_v58  ;;  %v580_v32 = vsub.f32 1.0, %v579_v1  ;;  %v596_v48 = vmul.f32 %v3117_v62, %v595_v5 }
 0x16b   : > { %v612_v37 = vadd.f32 %v3060_v12, %v611_v42  ;;  %v617_v61 = vand.u32 2147483647, %v2996_v50  ;;  %v3235_v1 = vsel %vm482_vm15, %v651_v55, 0.0  ;;  %v978_v45 = vmul.f32 %v2939_v29, %v3201_v63 }
 0x16c   : > { %1857 = vmatpush.xpose.msk.msrb.mxu0 %vm1064_vm1, %v981_v18  ;;  %1901 = vmatpush.xpose.msk.msra.mxu2 %vm1064_vm1, %v981_v18  ;;  %v632_v18 = vand.u32 2147483647, %v2988_v57  ;;  %v631_v56 = vsel %vm3206_vm2, %v3044_v34, %v627_v20  ;;  %vm568_vm11 = vweird.f32 %v3102_v39  ;;  %v581_v42 = vmul.f32 %v3146_v0, %v580_v32  ;;  %vm3275_vm2 = vmor %vm598_vm10, %vm599_vm12 }
 0x16d   : > { %vm481_vm6 = vcmp.gt.f32.partialorder %v2988_v57, 0.0  ;;  %v597_v52 = vadd.f32 %v3117_v62, %v596_v48  ;;  %v616_v55 = vsel %vm3243_vm7, %v3060_v12, %v612_v37  ;;  %vm618_vm15 = vcmp.eq.f32.partialorder %v617_v61, 8.507059e+37  ;;  %v3289_v61 = vpop.xlane.xlu0 %425 }
 0x16e   : > { %v3168_v44 = vpop.f32.mrf.mxu3  ;;  %v3175_v54 = vpop.eup %2054  ;;  %vm3227_vm5 = vcmp.eq.f32.partialorder %v632_v18, 8.507059e+37  ;;  %v604_v18 = vand.u32 2147483648, %v3046_v46  ;;  %v977_v48 = vmul.f32 %v2931_v25, %v3235_v1  ;;  %vm583_vm14 = vweird.f32 %v3067_v30 }
 0x16f   : > { %v564_v47 = vmul.f32 %v3175_v54, %v3102_v39  ;;  %v3212_v33 = vpop.eup %2056  ;;  %v3216_v36 = vpop.xlane.xlu1 %431  ;;  %v636_v29 = vsel %vm3227_vm5, %v635_v60, %v631_v56  ;;  %vm584_vm13 = vweird.f32 %v3146_v0  ;;  %v589_v56 = vand.u32 2147483648, %v3067_v30 }
 0x170   : > { %1858 = vmatpush.xpose.msk.msrb.mxu0 %vm1064_vm1, %v980_v22  ;;  %1902 = vmatpush.xpose.msk.msra.mxu2 %vm1064_vm1, %v980_v22  ;;  %v549_v51 = vmul.f32 %v3212_v33, %v3151_v59  ;;  %2060 = vrcp.f32 %v3216_v36  ;;  %v3256_v20 = vpop.eup %2058  ;;  %v3287_v37 = vsel %vm481_vm6, %v636_v29, 0.0  ;;  %v605_v16 = vor.u32 1.1754944e-38, %v604_v18  ;;  %vm3314_vm12 = vmor %vm583_vm14, %vm584_vm13 }
 0x171   : > { %v565_v5 = vsub.f32 1.0, %v564_v47  ;;  %v620_v47 = vor.u32 1.1754944e-38, %v619_v27  ;;  %2062 = vrcp.f32 %v3250_v53  ;;  %v534_v12 = vmul.f32 %v3256_v20, %v3179_v58 }
 0x172   : > { %v550_v32 = vsub.f32 1.0, %v549_v51  ;;  %vm480_vm5 = vcmp.gt.f32.partialorder %v2996_v50, 0.0  ;;  %v582_v51 = vadd.f32 %v3146_v0, %v581_v42  ;;  %v587_v57 = vand.u32 2147483647, %v3067_v30 }
 0x173   : > { %v566_v27 = vmul.f32 %v3175_v54, %v565_v5  ;;  %v621_v5 = vsel %vm618_vm15, %v620_v47, %v616_v55  ;;  %v601_v34 = vsel %vm3275_vm2, %v3117_v62, %v597_v52  ;;  %vm569_vm10 = vweird.f32 %v3175_v54 }
 0x174   : > { %1859 = vmatpush.xpose.msk.msrb.mxu0 %vm1064_vm1, %v979_v49  ;;  %1903 = vmatpush.xpose.msk.msra.mxu2 %vm1064_vm1, %v979_v49  ;;  %v602_v49 = vand.u32 2147483647, %v3046_v46  ;;  %v572_v47 = vand.u32 2147483647, %v3102_v39  ;;  %v976_v62 = vmul.f32 %v2927_v23, %v3287_v37  ;;  %2064 = vrcp.f32 %v3289_v61  ;;  %vm3356_vm15 = vmor %vm568_vm11, %vm569_vm10 }
 0x175   : > { %v551_v29 = vmul.f32 %v3212_v33, %v550_v32  ;;  %v574_v52 = vand.u32 2147483648, %v3102_v39  ;;  %v2362_v55 = vmov 1.0   ;;  %v567_v60 = vadd.f32 %v3175_v54, %v566_v27 }
 0x176   : > { %v3231_v22 = vpop.f32.mrf.mxu3  ;;  %v3295_v25 = vpop.eup %2060  ;;  %vm3302_vm7 = vcmp.eq.f32.partialorder %v602_v49, 8.507059e+37  ;;  %v3325_v49 = vsel %vm480_vm5, %v621_v5, 0.0  ;;  %1807 = vmatmul.msk.f32.vlgmr.msra.gmra.mxu0 %vm423_vm0, %v2362_v55  ;;  %v590_v32 = vor.u32 1.1754944e-38, %v589_v56  ;;  %vm479_vm6 = vcmp.gt.f32.partialorder %v3046_v46, 0.0 }
 0x177   : > { %v3333_v23 = vpop.eup %2062  ;;  %v606_v50 = vsel %vm3302_vm7, %v605_v16, %v601_v34  ;;  %v519_v5 = vmul.f32 %v3295_v25, %v3216_v36  ;;  %v586_v3 = vsel %vm3314_vm12, %v3146_v0, %v582_v51  ;;  %vm588_vm0 = vcmp.eq.f32.partialorder %v587_v57, 8.507059e+37 }
 0x178   : > { %1860 = vmatpush.xpose.msk.msrb.mxu0 %vm1064_vm1, %v978_v45  ;;  %1904 = vmatpush.xpose.msk.msra.mxu2 %vm1064_vm1, %v978_v45  ;;  %v557_v27 = vand.u32 2147483647, %v3151_v59  ;;  %v975_v0 = vmul.f32 %v2923_v21, %v3325_v49  ;;  %vm554_vm2 = vweird.f32 %v3212_v33  ;;  %v3370_v16 = vsel %vm479_vm6, %v606_v50, 0.0 }
 0x179   : > { %v552_v51 = vadd.f32 %v3212_v33, %v551_v29  ;;  %v575_v21 = vor.u32 1.1754944e-38, %v574_v52  ;;  %vm478_vm11 = vcmp.gt.f32.partialorder %v3067_v30, 0.0  ;;  %v591_v57 = vsel %vm588_vm0, %v590_v32, %v586_v3 }
 0x17a   : > { %v3380_v34 = vpop.eup %2064  ;;  %v520_v46 = vsub.f32 1.0, %v519_v5  ;;  %v504_v45 = vmul.f32 %v3333_v23, %v3250_v53  ;;  %v571_v7 = vsel %vm3356_vm15, %v3175_v54, %v567_v60  ;;  %vm3402_vm14 = vcmp.eq.f32.partialorder %v557_v27, 8.507059e+37 }
 0x17b   : > { %vm477_vm13 = vcmp.gt.f32.partialorder %v3102_v39, 0.0  ;;  %v974_v54 = vmul.f32 %v2919_v19, %v3370_v16  ;;  %vm538_vm5 = vweird.f32 %v3179_v58  ;;  %v3414_v52 = vsel %vm478_vm11, %v591_v57, 0.0 }
 0x17c   : > { %1861 = vmatpush.xpose.msk.msrb.mxu0 %vm1064_vm1, %v977_v48  ;;  %1905 = vmatpush.xpose.msk.msra.mxu2 %vm1064_vm1, %v977_v48  ;;  %v535_v48 = vsub.f32 1.0, %v534_v12  ;;  %vm3987_vm7 = vcmp.eq.s32.totalorder %v2589_v9, %v2592_v10  ;;  %v544_v60 = vand.u32 2147483648, %v3179_v58  ;;  %v489_v19 = vmul.f32 %v3380_v34, %v3289_v61 }
 0x17d   : > { %v560_v32 = vor.u32 1.1754944e-38, %v559_v13  ;;  %v505_v30 = vsub.f32 1.0, %v504_v45  ;;  %v521_v5 = vmul.f32 %v3295_v25, %v520_v46  ;;  %vm3988_vm10 = vcmp.eq.s32.totalorder %v2589_v9, %v2595_v11 }
 0x17e   : > { %v3306_v18 = vpop.f32.mrf.mxu3  ;;  %vm476_vm6 = vcmp.gt.f32.partialorder %v3151_v59, 0.0  ;;  %vm3447_vm0 = vcmp.eq.f32.partialorder %v542_v14, 8.507059e+37  ;;  %vm524_vm15 = vweird.f32 %v3295_v25  ;;  %v545_v12 = vor.u32 1.1754944e-38, %v544_v60 }
 0x17f   : > { %v529_v13 = vand.u32 2147483648, %v3216_v36  ;;  %v506_v56 = vmul.f32 %v3333_v23, %v505_v30  ;;  %v514_v45 = vand.u32 2147483648, %v3250_v53  ;;  %v497_v60 = vand.u32 2147483647, %v3289_v61  ;;  %v4006_v30 = vld [vmem:[#allocation21_spill] sm:$0xff] }
 0x180   : > { %1938 = vmatpush.lsf.msk.msk.msrb.mxu2 %vm390_vm3, %v2362_v55  ;;  %1862 = vmatpush.xpose.msk.msrb.mxu0 %vm1064_vm1, %v976_v62  ;;  %vm553_vm3 = vweird.f32 %v3151_v59 }
 0x181   : > { %v507_v59 = vadd.f32 %v3333_v23, %v506_v56 }
 0x182   : > { %1906 = vmatpush.xpose.msk.msra.mxu2 %vm1064_vm1, %v976_v62 }
 0x184   : > { %1863 = vmatpush.xpose.msk.msrb.mxu0 %vm1064_vm1, %v975_v0 }
 0x186   : > { %1939 = vmatpush.lsf.msk.msk.msrb.mxu2 %vm389_vm8, %v2362_v55  ;;  %vm3364_vm8 = vcmp.eq.f32.partialorder %v572_v47, 8.507059e+37  ;;  %v536_v47 = vmul.f32 %v3256_v20, %v535_v48  ;;  %v3388_v42 = vpop.f32.mrf.mxu3 }
 0x187   : > { %v576_v50 = vsel %vm3364_vm8, %v575_v21, %v571_v7  ;;  %vm3994_vm8 = vcmp.eq.s32.totalorder %v2589_v9, %v2693_v28  ;;  %v512_v7 = vand.u32 2147483647, %v3250_v53 }
 0x188   : > { %1940 = vmatpush.lsf.msk.msk.msrb.mxu2 %vm388_vm4, %v2362_v55  ;;  %vm3398_vm4 = vmor %vm553_vm3, %vm554_vm2  ;;  %1864 = vmatpush.xpose.msk.msrb.mxu0 %vm1064_vm1, %v974_v54  ;;  %v537_v48 = vadd.f32 %v3256_v20, %v536_v47  ;;  %v3453_v11 = vsel %vm477_vm13, %v576_v50, 0.0  ;;  %vm523_vm3 = vweird.f32 %v3216_v36  ;;  %vm3993_vm2 = vcmp.eq.s32.totalorder %v2589_v9, %v2581_v2 }
 0x189   : > { %v556_v10 = vsel %vm3398_vm4, %v3212_v33, %v552_v51  ;;  %v973_v33 = vmul.f32 %v2917_v17, %v3414_v52  ;;  %v522_v2 = vadd.f32 %v3295_v25, %v521_v5  ;;  %v527_v51 = vand.u32 2147483647, %v3216_v36  ;;  %vm3484_vm11 = vmor %vm523_vm3, %vm524_vm15 }
 0x18a   : > { %1907 = vmatpush.xpose.msk.msra.mxu2 %vm1064_vm1, %v975_v0  ;;  %v490_v0 = vsub.f32 1.0, %v489_v19  ;;  %v561_v17 = vsel %vm3402_vm14, %v560_v32, %v556_v10  ;;  %v972_v57 = vmul.f32 %v2911_v15, %v3453_v11  ;;  %vm475_vm4 = vcmp.gt.f32.partialorder %v3179_v58, 0.0  ;;  %v4025_v32 = vld [vmem:[#allocation33_spill] sm:$0xff] }
 0x18b   : > { %v3491_v46 = vsel %vm476_vm6, %v561_v17, 0.0  ;;  %vm508_vm14 = vweird.f32 %v3250_v53  ;;  %vm509_vm13 = vweird.f32 %v3333_v23  ;;  %v530_v47 = vor.u32 1.1754944e-38, %v529_v13  ;;  %v4014_v13 = vld [vmem:[#allocation23_spill] sm:$0xff] }
 0x18c   : > { %1865 = vmatpush.xpose.msk.msrb.mxu0 %vm1064_vm1, %v973_v33  ;;  %v491_v15 = vmul.f32 %v3380_v34, %v490_v0  ;;  %v971_v62 = vmul.f32 %v2905_v6, %v3491_v46  ;;  %vm494_vm6 = vweird.f32 %v3380_v34  ;;  %v515_v6 = vor.u32 1.1754944e-38, %v514_v45  ;;  %v4016_v45 = vld [vmem:[#allocation40_spill] sm:$0xff] }
 0x18d   : > { %vm474_vm3 = vcmp.gt.f32.partialorder %v3216_v36, 0.0  ;;  %vm513_vm15 = vcmp.eq.f32.partialorder %v512_v7, 8.507059e+37  ;;  %v4018_v7 = vld [vmem:[#allocation39_spill] sm:$0xff] }
 0x18e   : > { %1941 = vmatpush.lsf.msk.msk.msrb.mxu2 %vm387_vm9, %v2362_v55  ;;  %vm539_vm9 = vweird.f32 %v3256_v20  ;;  %v3472_v21 = vpop.f32.mrf.mxu3  ;;  %v492_v58 = vadd.f32 %v3380_v34, %v491_v15 }
 0x18f   : > { %vm3440_vm12 = vmor %vm538_vm5, %vm539_vm9  ;;  %vm3997_vm5 = vcmp.eq.s32.totalorder %v2589_v9, %v2701_v31  ;;  %v526_v31 = vsel %vm3484_vm11, %v3295_v25, %v522_v2  ;;  %vm528_vm9 = vcmp.eq.f32.partialorder %v527_v51, 8.507059e+37  ;;  %vm4005_vm11 = vcmp.eq.s32.totalorder %v2589_v9, %v2750_v40  ;;  %v4008_v40 = vld [vmem:[#allocation27_spill] sm:$0xff]  ;;  %v4015_v51 = vld [vmem:[#allocation24_spill] sm:$0xff] }
 0x190   : > { %1942 = vmatpush.lsf.msk.msk.msrb.mxu2 %vm3987_vm7, %v2362_v55  ;;  %v541_v39 = vsel %vm3440_vm12, %v3256_v20, %v537_v48  ;;  %1866 = vmatpush.xpose.msk.msrb.mxu0 %vm1064_vm1, %v972_v57  ;;  %vm3998_vm7 = vcmp.eq.s32.totalorder %v2589_v9, %v2730_v35  ;;  %vm493_vm12 = vweird.f32 %v3289_v61  ;;  %v499_v35 = vand.u32 2147483648, %v3289_v61 }
 0x191   : > { %v546_v28 = vsel %vm3447_vm0, %v545_v12, %v541_v39  ;;  %vm4001_vm0 = vcmp.eq.s32.totalorder %v2589_v9, %v2745_v38  ;;  %v531_v25 = vsel %vm528_vm9, %v530_v47, %v526_v31  ;;  %vm472_vm9 = vcmp.gt.f32.partialorder %v3289_v61, 0.0  ;;  %v4013_v12 = vld [vmem:[#allocation25_spill] sm:$0xff] }
 0x192   : > { %1908 = vmatpush.xpose.msk.msra.mxu2 %vm1064_vm1, %v974_v54  ;;  %v838_v54 = vpop.f32.mrf.mxu1  ;;  %v3524_v14 = vsel %vm475_vm4, %v546_v28, 0.0  ;;  %v3555_v50 = vsel %vm474_vm3, %v531_v25, 0.0  ;;  %vm473_vm4 = vcmp.gt.f32.partialorder %v3250_v53, 0.0  ;;  %v4009_v53 = vld [vmem:[#allocation20_spill] sm:$0xff]  ;;  %v1061_v56 = vmul.f32 %v3472_v21, %v3144_v43 }
 0x193   : > { %v970_v36 = vmul.f32 %v2899_v4, %v3524_v14  ;;  %v969_v48 = vmul.f32 %v4008_v40, %v3555_v50  ;;  %v1060_v2 = vmul.f32 %v3388_v42, %v3183_v24  ;;  %v1059_v28 = vmul.f32 %v3306_v18, %v3201_v63  ;;  %v4017_v18 = vld [vmem:[#allocation26_spill] sm:$0xff] }
 0x194   : > { %1867 = vmatpush.xpose.msk.msrb.mxu0 %vm1064_vm1, %v971_v62  ;;  %v1058_v21 = vmul.f32 %v3231_v22, %v3235_v1  ;;  %v1057_v42 = vmul.f32 %v3168_v44, %v3287_v37  ;;  %v1056_v47 = vmul.f32 %v4016_v45, %v3325_v49  ;;  %v1055_v31 = vmul.f32 %v4018_v7, %v3370_v16  ;;  %v4019_v44 = vld [vmem:[#allocation38_spill] sm:$0xff] }
 0x196   : > { %1943 = vmatpush.lsf.msk.msk.msrb.mxu2 %vm3988_vm10, %v2362_v55  ;;  %vm3518_vm10 = vmor %vm508_vm14, %vm509_vm13  ;;  %v1042_v38 = vpop.f32.mrf.mxu3  ;;  %vm498_vm14 = vcmp.eq.f32.partialorder %v497_v60, 8.507059e+37  ;;  %vm4007_vm13 = vcmp.eq.s32.totalorder %v2589_v9, %v4006_v30  ;;  %v4027_v30 = vld [vmem:[#allocation29_spill] sm:$0xff] }
 0x197   : > { %v511_v19 = vsel %vm3518_vm10, %v3333_v23, %v507_v59  ;;  %v1062_v61 = vmul.f32 %v1042_v38, %v3125_v26  ;;  %v897_v59 = vmul.f32 %v4017_v18, %v3201_v63  ;;  %v4021_v63 = vld [vmem:[#allocation36_spill] sm:$0xff]  ;;  %v899_v40 = vmul.f32 %v4027_v30, %v3144_v43 }
 0x198   : > { %1944 = vmatpush.lsf.msk.msk.msrb.mxu2 %vm3993_vm2, %v2362_v55  ;;  %vm4002_vm2 = vcmp.eq.s32.totalorder %v2589_v9, %v2753_v41  ;;  %v500_v41 = vor.u32 1.1754944e-38, %v499_v35  ;;  %v516_v23 = vsel %vm513_vm15, %v515_v6, %v511_v19  ;;  %1868 = vmatpush.xpose.msk.msrb.mxu0 %vm1064_vm1, %v970_v36  ;;  %v1052_v35 = vmul.f32 %v4021_v63, %v3491_v46  ;;  %v4022_v6 = vld [vmem:[#allocation28_spill] sm:$0xff]  ;;  %v4024_v19 = vld [vmem:[#allocation34_spill] sm:$0xff] }
 0x199   : > { %v729_v10 = vsel %vm473_vm4, %v516_v23, 0.0  ;;  %v898_v25 = vmul.f32 %v4022_v6, %v3183_v24  ;;  %v1050_v38 = vmul.f32 %v4024_v19, %v3555_v50  ;;  %v4026_v23 = vld [vmem:[#allocation32_spill] sm:$0xff] }
 0x19a   : > { %1909 = vmatpush.xpose.msk.msra.mxu2 %vm1064_vm1, %v973_v33  ;;  %v841_v3 = vpop.f32.mrf.mxu1  ;;  %v4011_v33 = vld [vmem:[#allocation19_spill] sm:$0xff]  ;;  %v968_v0 = vmul.f32 %v4013_v12, %v729_v10 }
 0x19b   : > { %v887_v15 = vmul.f32 %v841_v3, %v729_v10 }
 0x19c   : > { %1869 = vmatpush.xpose.msk.msrb.mxu0 %vm1064_vm1, %v969_v48 }
 0x19e   : > { %1945 = vmatpush.lsf.msk.msk.msrb.mxu2 %vm3994_vm8, %v2362_v55  ;;  %vm3551_vm8 = vmor %vm493_vm12, %vm494_vm6 }
 0x19f   : > { %v496_v4 = vsel %vm3551_vm8, %v3380_v34, %v492_v58  ;;  %v1045_v34 = vpop.f32.mrf.mxu3  ;;  %v4023_v58 = vld [vmem:[#allocation35_spill] sm:$0xff] }
 0x1a0   : > { %1946 = vmatpush.lsf.msk.msk.msrb.mxu2 %vm3997_vm5, %v2362_v55  ;;  %vm4010_vm5 = vcmp.eq.s32.totalorder %v2589_v9, %v4009_v53  ;;  %v501_v5 = vsel %vm498_vm14, %v500_v41, %v496_v4  ;;  %v1063_v27 = vmul.f32 %v1045_v34, %v3079_v8  ;;  %1870 = vmatpush.xpose.msk.msrb.mxu0 %vm1064_vm1, %v968_v0  ;;  %v4028_v53 = vld [vmem:[#allocation30_spill] sm:$0xff] }
 0x1a1   : > { %v728_v17 = vsel %vm472_vm9, %v501_v5, 0.0  ;;  %v1051_v60 = vmul.f32 %v4023_v58, %v3524_v14  ;;  %v1049_v41 = vmul.f32 %v4025_v32, %v729_v10  ;;  %v900_v10 = vmul.f32 %v4028_v53, %v3125_v26  ;;  %v4029_v5 = vld [vmem:[#allocation31_spill] sm:$0xff] }
 0x1a2   : > { %1910 = vmatpush.xpose.msk.msra.mxu2 %vm1064_vm1, %v972_v57  ;;  %1423 = vmatpush.msrb.mxu1 %v1063_v27  ;;  %v967_v39 = vmul.f32 %v4014_v13, %v728_v17  ;;  %v896_v57 = vmul.f32 %v4015_v51, %v3235_v1  ;;  %v844_v20 = vpop.f32.mrf.mxu1  ;;  %v1054_v1 = vmul.f32 %v4019_v44, %v3414_v52 }
 0x1a3   : > { %v1048_v4 = vmul.f32 %v4026_v23, %v728_v17  ;;  %v901_v43 = vmul.f32 %v4029_v5, %v3079_v8  ;;  %v4030_v8 = vld [vmem:[#allocation22_spill] sm:$0xff] }
 0x1a4   : > { %1424 = vmatpush.msrb.mxu1 %v1062_v61  ;;  %1871 = vmatpush.xpose.msk.msrb.mxu0 %vm1064_vm1, %v967_v39  ;;  %v895_v27 = vmul.f32 %v4030_v8, %v3287_v37 }
 0x1a6   : > { %1947 = vmatpush.lsf.msk.msk.msrb.mxu2 %vm3998_vm7, %v2362_v55  ;;  %vm4012_vm7 = vcmp.eq.s32.totalorder %v2589_v9, %v4011_v33  ;;  %v886_v9 = vmul.f32 %v838_v54, %v728_v17  ;;  %1425 = vmatpush.msrb.mxu1 %v1061_v56  ;;  %v888_v54 = vmul.f32 %v844_v20, %v3555_v50 }
 0x1a8   : > { %1948 = vmatpush.lsf.msk.msk.msrb.mxu2 %vm4001_vm0, %v2362_v55  ;;  %1426 = vmatpush.msrb.mxu1 %v1060_v2 }
 0x1a9   : > { %1872 = vmatmul.msk.f32.vlgmr.msrb.gmra.mxu0 %vm1064_vm1, %v886_v9 }
 0x1aa   : > { %1911 = vmatpush.xpose.msk.msra.mxu2 %vm1064_vm1, %v971_v62  ;;  %1427 = vmatpush.msrb.mxu1 %v1059_v28  ;;  %v847_v22 = vpop.f32.mrf.mxu1  ;;  %v4020_v62 = vld [vmem:[#allocation37_spill] sm:$0xff] }
 0x1ab   : > { %v1053_v29 = vmul.f32 %v4020_v62, %v3453_v11  ;;  %v889_v24 = vmul.f32 %v847_v22, %v3524_v14 }
 0x1ac   : > { %1428 = vmatpush.msrb.mxu1 %v1058_v21 }
 0x1ae   : > { %1949 = vmatpush.lsf.msk.msk.msrb.mxu2 %vm4002_vm2, %v2362_v55  ;;  %1429 = vmatpush.msrb.mxu1 %v1057_v42 }
 0x1b0   : > { %1950 = vmatpush.lsf.msk.msk.msrb.mxu2 %vm4005_vm11, %v2362_v55  ;;  %1430 = vmatpush.msrb.mxu1 %v1056_v47 }
 0x1b1   : > { %1873 = vmatmul.msk.f32.gmra.mxu0 %vm1064_vm1, %v887_v15 }
 0x1b2   : > { %1912 = vmatpush.xpose.msk.msra.mxu2 %vm1064_vm1, %v970_v36  ;;  %1431 = vmatpush.msrb.mxu1 %v1055_v31  ;;  %v850_v36 = vpop.f32.mrf.mxu1 }
 0x1b3   : > { %v890_v50 = vmul.f32 %v850_v36, %v3491_v46 }
 0x1b4   : > { %1432 = vmatpush.msrb.mxu1 %v1054_v1 }
 0x1b6   : > { %1951 = vmatpush.lsf.msk.msk.msrb.mxu2 %vm4007_vm13, %v2362_v55  ;;  %1433 = vmatpush.msrb.mxu1 %v1053_v29 }
 0x1b8   : > { %1952 = vmatpush.lsf.msk.msk.msrb.mxu2 %vm4010_vm5, %v2362_v55  ;;  %1434 = vmatpush.msrb.mxu1 %v1052_v35 }
 0x1b9   : > { %1874 = vmatmul.msk.f32.gmra.mxu0 %vm1064_vm1, %v888_v54 }
 0x1ba   : > { %1913 = vmatpush.xpose.msk.msra.mxu2 %vm1064_vm1, %v969_v48  ;;  %1435 = vmatpush.msrb.mxu1 %v1051_v60  ;;  %v853_v48 = vpop.f32.mrf.mxu1 }
 0x1bb   : > { %v891_v14 = vmul.f32 %v853_v48, %v3453_v11 }
 0x1bc   : > { %1436 = vmatpush.msrb.mxu1 %v1050_v38 }
 0x1be   : > { %1953 = vmatpush.lsf.msk.msk.msrb.mxu2 %vm4012_vm7, %v2362_v55  ;;  %1437 = vmatpush.msrb.mxu1 %v1049_v41 }
 0x1bf   : > { %1935 = vllmr.2.mxu2 }
 0x1c0   : > { %1914 = vmatpush.xpose.msk.msra.mxu2 %vm1064_vm1, %v968_v0  ;;  %1438 = vmatpush.msrb.mxu1 %v1048_v4 }
 0x1c1   : > { %1875 = vmatmul.msk.f32.gmra.mxu0 %vm1064_vm1, %v889_v24 }
 0x1c2   : > { %v856_v3 = vpop.f32.mrf.mxu1 }
 0x1c3   : > { %v892_v34 = vmul.f32 %v856_v3, %v3414_v52  ;;  %v2363_v52 = vmov 0  }
 0x1c4   : > { %1915 = vmatpush.xpose.msk.msra.mxu2 %vm1064_vm1, %v967_v39 }
 0x1c7   : > { %1882 = vmatmul.msk.f32.vlgmr.msra.gmra.mxu2 %vm1064_vm1, %v896_v57 }
 0x1c9   : > { %1876 = vmatmul.msk.f32.gmra.mxu0 %vm1064_vm1, %v890_v50 }
 0x1ca   : > { %v859_v46 = vpop.f32.mrf.mxu1 }
 0x1cb   : > { %v893_v26 = vmul.f32 %v859_v46, %v3370_v16 }
 0x1cf   : > { %1883 = vmatmul.msk.f32.gmra.mxu2 %vm1064_vm1, %v897_v59 }
 0x1d1   : > { %1877 = vmatmul.msk.f32.gmra.mxu0 %vm1064_vm1, %v891_v14 }
 0x1d2   : > { %v862_v33 = vpop.f32.mrf.mxu1 }
 0x1d3   : > { %v894_v11 = vmul.f32 %v862_v33, %v3325_v49 }
 0x1d7   : > { %1884 = vmatmul.msk.f32.gmra.mxu2 %vm1064_vm1, %v898_v25 }
 0x1d9   : > { %1878 = vmatmul.msk.f32.gmra.mxu0 %vm1064_vm1, %v892_v34 }
 0x1df   : > { %1885 = vmatmul.msk.f32.gmra.mxu2 %vm1064_vm1, %v899_v40 }
 0x1e1   : > { %1879 = vmatmul.msk.f32.gmra.mxu0 %vm1064_vm1, %v893_v26 }
 0x1e7   : > { %1886 = vmatmul.msk.f32.gmra.mxu2 %vm1064_vm1, %v900_v10 }
 0x1e9   : > { %1880 = vmatmul.msk.f32.gmra.mxu0 %vm1064_vm1, %v894_v11 }
 0x1ef   : > { %1887 = vmatmul.msk.f32.gmra.mxu2 %vm1064_vm1, %v901_v43 }
 0x1f1   : > { %1881 = vmatmul.msk.f32.gmra.mxu0 %vm1064_vm1, %v895_v27 }
 0x1f3   : > { %v812_v12 = vpop.f32.mrf.mxu0 }
 0x1f4   : > { %vm1242_vm10 = vcmp.gt.f32.partialorder %v812_v12, 0.0  ;;  %v3681_v6 = vperm.slane %v812_v12, 0 }
 0x1f5   : > { %v1243_v0 = vsel %vm1242_vm10, 1, %v2363_v52 }
 0x1f6   : > { %v1244_v17 = vperm.slane %v1243_v0, 0 }
 0x1f8   : > { %vm3655_vm12 = vcmp.eq.s32.totalorder %v1244_v17, 1 }
 0x226   : > { %v1178_v61 = vpop.f32.mrf.mxu0 }
 0x227   : > { %v1226_v13 = vmul.f32 0.5, %v1178_v61 }
 0x229   : > { %v1246_v49 = vsel %vm3655_vm12, %v1226_v13, -inf }
 0x22a   : > { %1262 = vmax.xlane.f32.xlu1 %v1246_v49 }
 0x22e   : > { %v1181_v39 = vpop.f32.mrf.mxu0 }
 0x22f   : > { %v1227_v56 = vmul.f32 0.5, %v1181_v39 }
 0x231   : > { %v1247_v37 = vsel %vm3655_vm12, %v1227_v56, -inf }
 0x232   : > { %1264 = vmax.xlane.f32.xlu2 %v1247_v37 }
 0x236   : > { %v1184_v9 = vpop.f32.mrf.mxu0 }
 0x237   : > { %v1228_v2 = vmul.f32 0.5, %v1184_v9 }
 0x239   : > { %v1248_v51 = vsel %vm3655_vm12, %v1228_v2, -inf }
 0x23a   : > { %1266 = vmax.xlane.f32.xlu0 %v1248_v51 }
 0x23e   : > { %v1187_v57 = vpop.f32.mrf.mxu0 }
 0x23f   : > { %v1229_v20 = vmul.f32 0.5, %v1187_v57 }
 0x241   : > { %v1249_v28 = vsel %vm3655_vm12, %v1229_v20, -inf }
 0x242   : > { %1268 = vmax.xlane.f32.xlu1 %v1249_v28 }
 0x246   : > { %v1190_v21 = vpop.f32.mrf.mxu0 }
 0x247   : > { %v1230_v42 = vmul.f32 0.5, %v1190_v21 }
 0x249   : > { %v1250_v15 = vsel %vm3655_vm12, %v1230_v42, -inf }
 0x24a   : > { %1270 = vmax.xlane.f32.xlu2 %v1250_v15  ;;  %v1208_v4 = vpop.f32.mrf.mxu2 }
 0x24b   : > { %v1236_v46 = vmul.f32 0.5, %v1208_v4 }
 0x24d   : > { %v3710_v27 = vsel %vm3655_vm12, %v1236_v46, -inf }
 0x24e   : > { %v1193_v45 = vpop.f32.mrf.mxu0 }
 0x24f   : > { %v1231_v47 = vmul.f32 0.5, %v1193_v45 }
 0x251   : > { %v1251_v18 = vsel %vm3655_vm12, %v1231_v47, -inf }
 0x252   : > { %1272 = vmax.xlane.f32.xlu0 %v1251_v18  ;;  %v1211_v3 = vpop.f32.mrf.mxu2 }
 0x253   : > { %v1237_v0 = vmul.f32 0.5, %v1211_v3 }
 0x255   : > { %v3719_v39 = vsel %vm3655_vm12, %v1237_v0, -inf }
 0x256   : > { %v1196_v59 = vpop.f32.mrf.mxu0 }
 0x257   : > { %v1232_v7 = vmul.f32 0.5, %v1196_v59 }
 0x259   : > { %v3673_v31 = vsel %vm3655_vm12, %v1232_v7, -inf }
 0x25a   : > { %1274 = vmax.xlane.f32.xlu1 %v3673_v31  ;;  %v1214_v12 = vpop.f32.mrf.mxu2 }
 0x25e   : > { %v1199_v22 = vpop.f32.mrf.mxu0 }
 0x25f   : > { %v1233_v44 = vmul.f32 0.5, %v1199_v22 }
 0x261   : > { %v3678_v1 = vsel %vm3655_vm12, %v1233_v44, -inf }
 0x262   : > { %1276 = vmax.xlane.f32.xlu0 %v3678_v1  ;;  %v1217_v2 = vpop.f32.mrf.mxu2 }
 0x263   : > { %v1239_v42 = vmul.f32 0.5, %v1217_v2 }
 0x265   : > { %v3739_v7 = vsel %vm3655_vm12, %v1239_v42, -inf }
 0x266   : > { %v1202_v60 = vpop.f32.mrf.mxu0 }
 0x267   : > { %v1234_v36 = vmul.f32 0.5, %v1202_v60 }
 0x269   : > { %v3692_v30 = vsel %vm3655_vm12, %v1234_v36, -inf }
 0x26e   : > { %v1205_v40 = vpop.f32.mrf.mxu0 }
 0x26f   : > { %v1235_v50 = vmul.f32 0.5, %v1205_v40 }
 0x271   : > { %v3701_v43 = vsel %vm3655_vm12, %v1235_v50, -inf }
 0x29d   : > { %v1263_v62 = vpop.xlane.xlu1 %1262 }
 0x29e   : > { %v1294_v29 = vsub.f32 %v1246_v49, %v1263_v62 }
 0x2a0   : > { %v1310_v54 = vmul.f32 1.442695, %v1294_v29 }
 0x2a2   : > { %2066 = vpow2.f32 %v1310_v54 }
 0x2a5   : > { %v1265_v63 = vpop.xlane.xlu2 %1264 }
 0x2a6   : > { %v1295_v35 = vsub.f32 %v1247_v37, %v1265_v63  ;;  %v1238_v37 = vmul.f32 0.5, %v1214_v12 }
 0x2a8   : > { %v2067_v25 = vpop.eup %2066  ;;  %v1312_v58 = vmul.f32 1.442695, %v1295_v35 }
 0x2a9   : > { %v3684_v19 = vmul.f32 %v2067_v25, %v3681_v6 }
 0x2aa   : > { %2068 = vpow2.f32 %v1312_v58 }
 0x2ab   : > { %1359 = vadd.xlane.f32.xlu2 %v3684_v19 }
 0x2ad   : > { %v1267_v38 = vpop.xlane.xlu0 %1266 }
 0x2ae   : > { %v1296_v32 = vsub.f32 %v1248_v51, %v1267_v38 }
 0x2b0   : > { %v2069_v41 = vpop.eup %2068  ;;  %v1314_v23 = vmul.f32 1.442695, %v1296_v32 }
 0x2b1   : > { %v3688_v24 = vmul.f32 %v2069_v41, %v3681_v6 }
 0x2b2   : > { %2070 = vpow2.f32 %v1314_v23 }
 0x2b3   : > { %1361 = vadd.xlane.f32.xlu1 %v3688_v24  ;;  %1278 = vmax.xlane.f32.xlu2 %v3692_v30 }
 0x2b5   : > { %v1269_v48 = vpop.xlane.xlu1 %1268 }
 0x2b6   : > { %v1297_v53 = vsub.f32 %v1249_v28, %v1269_v48  ;;  %v3729_v28 = vsel %vm3655_vm12, %v1238_v37, -inf }
 0x2b8   : > { %v2071_v10 = vpop.eup %2070  ;;  %v1316_v14 = vmul.f32 1.442695, %v1297_v53 }
 0x2b9   : > { %v3697_v5 = vmul.f32 %v2071_v10, %v3681_v6 }
 0x2ba   : > { %2072 = vpow2.f32 %v1316_v14 }
 0x2bb   : > { %1363 = vadd.xlane.f32.xlu0 %v3697_v5  ;;  %1280 = vmax.xlane.f32.xlu1 %v3701_v43 }
 0x2bd   : > { %v1271_v34 = vpop.xlane.xlu2 %1270 }
 0x2be   : > { %v1298_v26 = vsub.f32 %v1250_v15, %v1271_v34 }
 0x2c0   : > { %v2073_v33 = vpop.eup %2072  ;;  %v1318_v11 = vmul.f32 1.442695, %v1298_v26 }
 0x2c1   : > { %v3706_v8 = vmul.f32 %v2073_v33, %v3681_v6 }
 0x2c2   : > { %2074 = vpow2.f32 %v1318_v11 }
 0x2c3   : > { %1282 = vmax.xlane.f32.xlu0 %v3710_v27  ;;  %1365 = vadd.xlane.f32.xlu2 %v3706_v8 }
 0x2c5   : > { %v1273_v52 = vpop.xlane.xlu0 %1272 }
 0x2c6   : > { %v1299_v17 = vsub.f32 %v1251_v18, %v1273_v52  ;;  %v1220_v18 = vpop.f32.mrf.mxu2 }
 0x2c8   : > { %v2075_v61 = vpop.eup %2074  ;;  %v1320_v13 = vmul.f32 1.442695, %v1299_v17 }
 0x2c9   : > { %v3715_v49 = vmul.f32 %v2075_v61, %v3681_v6 }
 0x2ca   : > { %2076 = vpow2.f32 %v1320_v13 }
 0x2cb   : > { %1284 = vmax.xlane.f32.xlu2 %v3719_v39  ;;  %1367 = vadd.xlane.f32.xlu1 %v3715_v49 }
 0x2cd   : > { %v1275_v56 = vpop.xlane.xlu1 %1274 }
 0x2ce   : > { %v1300_v9 = vsub.f32 %v3673_v31, %v1275_v56  ;;  %v1240_v31 = vmul.f32 0.5, %v1220_v18  ;;  %v1223_v62 = vpop.f32.mrf.mxu2 }
 0x2cf   : > { %v1241_v29 = vmul.f32 0.5, %v1223_v62 }
 0x2d0   : > { %v2077_v51 = vpop.eup %2076  ;;  %v1322_v57 = vmul.f32 1.442695, %v1300_v9 }
 0x2d1   : > { %v3725_v20 = vmul.f32 %v2077_v51, %v3681_v6  ;;  %v3754_v54 = vsel %vm3655_vm12, %v1241_v29, -inf }
 0x2d2   : > { %2078 = vpow2.f32 %v1322_v57 }
 0x2d3   : > { %1369 = vadd.xlane.f32.xlu0 %v3725_v20  ;;  %1286 = vmax.xlane.f32.xlu1 %v3729_v28 }
 0x2d5   : > { %v1277_v21 = vpop.xlane.xlu0 %1276 }
 0x2d6   : > { %v1301_v15 = vsub.f32 %v3678_v1, %v1277_v21  ;;  %v3748_v1 = vsel %vm3655_vm12, %v1240_v31, -inf }
 0x2d8   : > { %v2079_v45 = vpop.eup %2078  ;;  %v1324_v47 = vmul.f32 1.442695, %v1301_v15 }
 0x2d9   : > { %v3735_v59 = vmul.f32 %v2079_v45, %v3681_v6 }
 0x2da   : > { %2080 = vpow2.f32 %v1324_v47 }
 0x2db   : > { %1288 = vmax.xlane.f32.xlu0 %v3739_v7  ;;  %1371 = vadd.xlane.f32.xlu2 %v3735_v59 }
 0x2e0   : > { %v2081_v22 = vpop.eup %2080 }
 0x2e1   : > { %v3744_v44 = vmul.f32 %v2081_v22, %v3681_v6 }
 0x2e3   : > { %1290 = vmax.xlane.f32.xlu2 %v3748_v1  ;;  %1373 = vadd.xlane.f32.xlu1 %v3744_v44 }
 0x2eb   : > { %1292 = vmax.xlane.f32.xlu1 %v3754_v54 }
 0x31e   : > { %v1360_v63 = vpop.xlane.xlu2 %1359 }
 0x31f   : > { %2082 = vrcp.f32 %v1360_v63 }
 0x325   : > { %v2083_v35 = vpop.eup %2082 }
 0x326   : > { %v1362_v25 = vpop.xlane.xlu1 %1361  ;;  %v1279_v58 = vpop.xlane.xlu2 %1278  ;;  %v3758_v60 = vmul.f32 %v2083_v35, %v3684_v19 }
 0x327   : > { %2084 = vrcp.f32 %v1362_v25  ;;  %v1302_v38 = vsub.f32 %v3692_v30, %v1279_v58 }
 0x328   : > { %1439 = vmatmul.f32.vlgmr.msrb.gmra.mxu1 %v3758_v60 }
 0x329   : > { %v1326_v36 = vmul.f32 1.442695, %v1302_v38 }
 0x32b   : > { %2086 = vpow2.f32 %v1326_v36 }
 0x32d   : > { %v2085_v16 = vpop.eup %2084 }
 0x32e   : > { %v1364_v32 = vpop.xlane.xlu0 %1363  ;;  %v1281_v41 = vpop.xlane.xlu1 %1280  ;;  %v3763_v23 = vmul.f32 %v2085_v16, %v3688_v24 }
 0x32f   : > { %2088 = vrcp.f32 %v1364_v32  ;;  %v1303_v4 = vsub.f32 %v3701_v43, %v1281_v41 }
 0x330   : > { %1442 = vmatmul.f32.gmra.mxu1 %v3763_v23 }
 0x331   : > { %v2087_v19 = vpop.eup %2086  ;;  %v1328_v40 = vmul.f32 1.442695, %v1303_v4 }
 0x332   : > { %v3768_v48 = vmul.f32 %v2087_v19, %v3681_v6 }
 0x333   : > { %2090 = vpow2.f32 %v1328_v40 }
 0x334   : > { %1375 = vadd.xlane.f32.xlu0 %v3768_v48 }
 0x335   : > { %v2089_v30 = vpop.eup %2088 }
 0x336   : > { %v1283_v50 = vpop.xlane.xlu0 %1282  ;;  %v1366_v53 = vpop.xlane.xlu2 %1365  ;;  %v3772_v10 = vmul.f32 %v2089_v30, %v3697_v5 }
 0x337   : > { %v1304_v24 = vsub.f32 %v3710_v27, %v1283_v50  ;;  %2092 = vrcp.f32 %v1366_v53 }
 0x338   : > { %1445 = vmatmul.f32.gmra.mxu1 %v3772_v10 }
 0x339   : > { %v2091_v14 = vpop.eup %2090  ;;  %v1330_v43 = vmul.f32 1.442695, %v1304_v24 }
 0x33a   : > { %v3777_v3 = vmul.f32 %v2091_v14, %v3681_v6 }
 0x33b   : > { %2094 = vpow2.f32 %v1330_v43 }
 0x33c   : > { %1377 = vadd.xlane.f32.xlu2 %v3777_v3 }
 0x33d   : > { %v2093_v34 = vpop.eup %2092 }
 0x33e   : > { %v1285_v46 = vpop.xlane.xlu2 %1284  ;;  %v1368_v26 = vpop.xlane.xlu1 %1367  ;;  %v3781_v33 = vmul.f32 %v2093_v34, %v3706_v8 }
 0x33f   : > { %v1305_v5 = vsub.f32 %v3719_v39, %v1285_v46  ;;  %2096 = vrcp.f32 %v1368_v26 }
 0x340   : > { %1448 = vmatmul.f32.gmra.mxu1 %v3781_v33 }
 0x341   : > { %v2095_v11 = vpop.eup %2094  ;;  %v1332_v27 = vmul.f32 1.442695, %v1305_v5 }
 0x342   : > { %v3786_v12 = vmul.f32 %v2095_v11, %v3681_v6 }
 0x343   : > { %2098 = vpow2.f32 %v1332_v27 }
 0x344   : > { %1379 = vadd.xlane.f32.xlu0 %v3786_v12 }
 0x345   : > { %v2097_v52 = vpop.eup %2096 }
 0x346   : > { %v1370_v0 = vpop.xlane.xlu0 %1369  ;;  %v1287_v17 = vpop.xlane.xlu1 %1286  ;;  %v3790_v61 = vmul.f32 %v2097_v52, %v3715_v49 }
 0x347   : > { %2100 = vrcp.f32 %v1370_v0  ;;  %v1306_v8 = vsub.f32 %v3729_v28, %v1287_v17 }
 0x348   : > { %1451 = vmatmul.f32.gmra.mxu1 %v3790_v61 }
 0x349   : > { %v2099_v13 = vpop.eup %2098  ;;  %v1334_v39 = vmul.f32 1.442695, %v1306_v8 }
 0x34a   : > { %v1354_v56 = vmul.f32 %v2099_v13, %v3681_v6 }
 0x34b   : > { %2102 = vpow2.f32 %v1334_v39 }
 0x34c   : > { %1381 = vadd.xlane.f32.xlu1 %v1354_v56 }
 0x34d   : > { %v2101_v37 = vpop.eup %2100 }
 0x34e   : > { %v1289_v9 = vpop.xlane.xlu0 %1288  ;;  %v1372_v2 = vpop.xlane.xlu2 %1371  ;;  %v3796_v51 = vmul.f32 %v2101_v37, %v3725_v20 }
 0x34f   : > { %v1307_v49 = vsub.f32 %v3739_v7, %v1289_v9  ;;  %2104 = vrcp.f32 %v1372_v2 }
 0x350   : > { %1454 = vmatmul.f32.gmra.mxu1 %v3796_v51 }
 0x351   : > { %v2103_v57 = vpop.eup %2102  ;;  %v1336_v28 = vmul.f32 1.442695, %v1307_v49 }
 0x352   : > { %v1355_v21 = vmul.f32 %v2103_v57, %v3681_v6 }
 0x353   : > { %2106 = vpow2.f32 %v1336_v28 }
 0x354   : > { %1383 = vadd.xlane.f32.xlu2 %v1355_v21 }
 0x355   : > { %v2105_v42 = vpop.eup %2104 }
 0x356   : > { %v1291_v15 = vpop.xlane.xlu2 %1290  ;;  %v1374_v45 = vpop.xlane.xlu1 %1373  ;;  %v3802_v47 = vmul.f32 %v2105_v42, %v3735_v59 }
 0x357   : > { %v1308_v20 = vsub.f32 %v3748_v1, %v1291_v15  ;;  %2108 = vrcp.f32 %v1374_v45 }
 0x358   : > { %1457 = vmatmul.f32.gmra.mxu1 %v3802_v47 }
 0x359   : > { %v2107_v18 = vpop.eup %2106  ;;  %v1338_v7 = vmul.f32 1.442695, %v1308_v20 }
 0x35a   : > { %v1356_v31 = vmul.f32 %v2107_v18, %v3681_v6 }
 0x35b   : > { %2110 = vpow2.f32 %v1338_v7 }
 0x35c   : > { %1385 = vadd.xlane.f32.xlu0 %v1356_v31 }
 0x35d   : > { %v2109_v22 = vpop.eup %2108 }
 0x35e   : > { %v1293_v62 = vpop.xlane.xlu1 %1292  ;;  %v3808_v29 = vmul.f32 %v2109_v22, %v3744_v44 }
 0x35f   : > { %v1309_v63 = vsub.f32 %v3754_v54, %v1293_v62 }
 0x360   : > { %1460 = vmatmul.f32.gmra.mxu1 %v3808_v29 }
 0x361   : > { %v2111_v59 = vpop.eup %2110  ;;  %v1340_v1 = vmul.f32 1.442695, %v1309_v63 }
 0x362   : > { %v1357_v35 = vmul.f32 %v2111_v59, %v3681_v6 }
 0x363   : > { %2112 = vpow2.f32 %v1340_v1 }
 0x364   : > { %1387 = vadd.xlane.f32.xlu1 %v1357_v35 }
 0x369   : > { %v2113_v25 = vpop.eup %2112 }
 0x36a   : > { %v1358_v58 = vmul.f32 %v2113_v25, %v3681_v6 }
 0x36c   : > { %1389 = vadd.xlane.f32.xlu2 %v1358_v58 }
 0x3a5   : > { %v1440_v5 = vpop.f32.mrf.mxu1 }
 0x3a7   : > { %v1376_v38 = vpop.xlane.xlu0 %1375 }
 0x3a8   : > { %2114 = vrcp.f32 %v1376_v38 }
 0x3ae   : > { %v2115_v36 = vpop.eup %2114 }
 0x3af   : > { %v1378_v16 = vpop.xlane.xlu2 %1377  ;;  %v1415_v44 = vmul.f32 %v2115_v36, %v3768_v48 }
 0x3b0   : > { %2116 = vrcp.f32 %v1378_v16 }
 0x3b1   : > { %1463 = vmatmul.f32.gmra.mxu1 %v1415_v44 }
 0x3b6   : > { %v2117_v54 = vpop.eup %2116 }
 0x3b7   : > { %v1380_v32 = vpop.xlane.xlu0 %1379  ;;  %v1416_v41 = vmul.f32 %v2117_v54, %v3777_v3 }
 0x3b8   : > { %2118 = vrcp.f32 %v1380_v32 }
 0x3b9   : > { %1466 = vmatmul.f32.gmra.mxu1 %v1416_v41 }
 0x3be   : > { %v2119_v4 = vpop.eup %2118 }
 0x3bf   : > { %v1382_v19 = vpop.xlane.xlu1 %1381  ;;  %v1417_v40 = vmul.f32 %v2119_v4, %v3786_v12  ;;  %v1443_v12 = vpop.f32.mrf.mxu1 }
 0x3c0   : > { %2120 = vrcp.f32 %v1382_v19 }
 0x3c1   : > { %1469 = vmatmul.f32.gmra.mxu1 %v1417_v40 }
 0x3c6   : > { %v2121_v6 = vpop.eup %2120 }
 0x3c7   : > { %v1384_v30 = vpop.xlane.xlu2 %1383  ;;  %v1418_v50 = vmul.f32 %v2121_v6, %v1354_v56  ;;  %v1446_v52 = vpop.f32.mrf.mxu1 }
 0x3c8   : > { %2122 = vrcp.f32 %v1384_v30 }
 0x3c9   : > { %1472 = vmatmul.f32.gmra.mxu1 %v1418_v50 }
 0x3ce   : > { %v2123_v48 = vpop.eup %2122 }
 0x3cf   : > { %v1386_v53 = vpop.xlane.xlu0 %1385  ;;  %v1419_v24 = vmul.f32 %v2123_v48, %v1355_v21  ;;  %v1449_v0 = vpop.f32.mrf.mxu1 }
 0x3d0   : > { %2124 = vrcp.f32 %v1386_v53 }
 0x3d1   : > { %1475 = vmatmul.f32.gmra.mxu1 %v1419_v24 }
 0x3d6   : > { %v2125_v14 = vpop.eup %2124 }
 0x3d7   : > { %v1388_v43 = vpop.xlane.xlu1 %1387  ;;  %v1420_v3 = vmul.f32 %v2125_v14, %v1356_v31  ;;  %v1452_v17 = vpop.f32.mrf.mxu1 }
 0x3d8   : > { %2126 = vrcp.f32 %v1388_v43 }
 0x3d9   : > { %1478 = vmatmul.f32.gmra.mxu1 %v1420_v3 }
 0x3de   : > { %v2127_v34 = vpop.eup %2126 }
 0x3df   : > { %v1390_v46 = vpop.xlane.xlu2 %1389  ;;  %v1421_v26 = vmul.f32 %v2127_v34, %v1357_v35  ;;  %v1455_v8 = vpop.f32.mrf.mxu1 }
 0x3e0   : > { %2128 = vrcp.f32 %v1390_v46 }
 0x3e1   : > { %1481 = vmatmul.f32.gmra.mxu1 %v1421_v26 }
 0x3e6   : > { %v2129_v11 = vpop.eup %2128 }
 0x3e7   : > { %v1422_v27 = vmul.f32 %v2129_v11, %v1358_v58  ;;  %v1458_v13 = vpop.f32.mrf.mxu1 }
 0x3e9   : > { %1484 = vmatmul.f32.gmra.mxu1 %v1422_v27  ;;  %1545 = vmatpush.xpose.msra.mxu3 %v1422_v27 }
 0x3ed   : > { %1546 = vmatpush.xpose.msra.mxu3 %v1421_v26 }
 0x3ef   : > { %v1461_v39 = vpop.f32.mrf.mxu1 }
 0x3f1   : > { %1547 = vmatpush.xpose.msra.mxu3 %v1420_v3 }
 0x3f5   : > { %1548 = vmatpush.xpose.msra.mxu3 %v1419_v24 }
 0x3f9   : > { %1549 = vmatpush.xpose.msra.mxu3 %v1418_v50 }
 0x3fd   : > { %1550 = vmatpush.xpose.msra.mxu3 %v1417_v40 }
 0x401   : > { %1551 = vmatpush.xpose.msra.mxu3 %v1416_v41 }
 0x405   : > { %1552 = vmatpush.xpose.msra.mxu3 %v1415_v44 }
 0x409   : > { %1553 = vmatpush.xpose.msra.mxu3 %v3808_v29 }
 0x40d   : > { %1554 = vmatpush.xpose.msra.mxu3 %v3802_v47 }
 0x411   : > { %1555 = vmatpush.xpose.msra.mxu3 %v3796_v51 }
 0x415   : > { %1556 = vmatpush.xpose.msra.mxu3 %v3790_v61 }
 0x419   : > { %1557 = vmatpush.xpose.msra.mxu3 %v3781_v33  ;;  %v4033_v33 = vlaneseq }
 0x41b   : > { %v369_v61 = vand.u32 127, %v4033_v33 }
 0x41d   : > { %1558 = vmatpush.xpose.msra.mxu3 %v3772_v10  ;;  %vm370_vm6 = vcmp.eq.s32.totalorder %v369_v61, 0 }
 0x421   : > { %1559 = vmatpush.xpose.msra.mxu3 %v3763_v23 }
 0x425   : > { %1560 = vmatpush.xpose.msra.mxu3 %v3758_v60 }
 0x428   : > { %1888 = vmatmul.msk.f32.vlgmr.msra.gmra.mxu3 %vm370_vm6, %v2362_v55 }
 0x42e   : > { %v1464_v56 = vpop.f32.mrf.mxu1 }
 0x436   : > { %v1467_v37 = vpop.f32.mrf.mxu1 }
 0x43e   : > { %v1470_v9 = vpop.f32.mrf.mxu1 }
 0x446   : > { %v1473_v2 = vpop.f32.mrf.mxu1 }
 0x44e   : > { %v1476_v49 = vpop.f32.mrf.mxu1 }
 0x456   : > { %v1479_v57 = vpop.f32.mrf.mxu1 }
 0x45e   : > { %v1482_v51 = vpop.f32.mrf.mxu1 }
 0x466   : > { %v1485_v28 = vpop.f32.mrf.mxu1 }
 0x467   : > { %1520 = vmatpush.msra.mxu2 %v1485_v28 }
 0x469   : > { %1521 = vmatpush.msra.mxu2 %v1482_v51 }
 0x46b   : > { %1522 = vmatpush.msra.mxu2 %v1479_v57 }
 0x46d   : > { %1523 = vmatpush.msra.mxu2 %v1476_v49 }
 0x46f   : > { %1524 = vmatpush.msra.mxu2 %v1473_v2 }
 0x471   : > { %1525 = vmatpush.msra.mxu2 %v1470_v9 }
 0x473   : > { %1526 = vmatpush.msra.mxu2 %v1467_v37 }
 0x475   : > { %1527 = vmatpush.msra.mxu2 %v1464_v56 }
 0x477   : > { %1528 = vmatpush.msra.mxu2 %v1461_v39 }
 0x479   : > { %1529 = vmatpush.msra.mxu2 %v1458_v13 }
 0x47b   : > { %1530 = vmatpush.msra.mxu2 %v1455_v8 }
 0x47d   : > { %1531 = vmatpush.msra.mxu2 %v1452_v17 }
 0x47f   : > { %1532 = vmatpush.msra.mxu2 %v1449_v0 }
 0x481   : > { %1533 = vmatpush.msra.mxu2 %v1446_v52 }
 0x483   : > { %1534 = vmatpush.msra.mxu2 %v1443_v12 }
 0x485   : > { %1535 = vmatpush.msra.mxu2 %v1440_v5 }
 0x486   : > { %1936 = vmatmul.lmr.bf16.vlgmr.msra.gmra.2.mxu2 }
 0x48e   : > { %1937 = vmatmul.lmr.bf16.gmra.2.mxu2 }
 0x4ab   : > { %v1562_v55 = vpop.f32.mrf.mxu3 }
 0x4ac   : > { %1565 = vst [vmem:[%s350_s0] sm:$0x1] %v1562_v55 }
 0x4ad   : > { %2277 = shalt.err (!%p2274_p5)
}
 0x4ae   : > { %1965 = dma.vmem_to_hbm [thread:$0]  (%p2491_p11), %s1600_s24, 16, %s1602_s7, %s1572_s26  }
 0x4af   : > { %s1897_s27 = sshll.u32 %s2474_s6, 4  ;;  %s344_s16 = scalar_lea.vmem [#allocation10], %s2563_s28 }
 0x4b0   : > { %s1582_s9 = scalar_lea.hbm %s3883_s4, %s1897_s27  ;;  %s1583_s17 = sshll.u32 %s344_s16, 4  ;;  %s1584_s17 = int_to_ptr.vmem [resolvable:$true] %s1583_s17 }
 0x4b1   : > { %s1585_s14 = sshll.u32 %s1582_s9, 4  ;;  %s1567_s0 = scalar_lea.sflag [#allocation4], %s2560_s25  ;;  %s1586_s14 = int_to_ptr.hbm [resolvable:$true] %s1585_s14 }
 0x4b2   : > { %s2292_s12 = sshra.s32 %s1586_s14, 4  ;;  %s2298_s7 = scalar_lea.hbm %s3883_s4, 32  ;;  %s2293_s12 = int_to_ptr.hbm [resolvable:$true] %s2292_s12 }
 0x4b3   : > { %s2294_s6 = scalar_lea.hbm %s2293_s12, 16  ;;  %p2299_p8 = scmp.lt.s32.totalorder %s2293_s12, %s3883_s4 }
 0x4b4   : > { %p2295_p7 = scmp.ne.s32.totalorder %s2293_s12, %s2294_s6  ;;  %p2300_p0 = scmp.lt.s32.totalorder %s2298_s7, %s2294_s6 }
 0x4b6   : > { %p2296_p10 = pnand %p2295_p7, %p2491_p11  ;;  %p2301_p6 = por %p2300_p0, %p2299_p8 }
 0x4b8   : > { %p2297_p13 = pneg %p2296_p10 }
 0x4ba   : > { %p2302_p9 = pnand %p2301_p6, %p2297_p13 }
 0x509   : > { %v1537_v60 = vpop.f32.mrf.mxu2 }
 0x50a   : > { %1543 = vst.msk [vmem:[%s344_s16] sm:$0xff] %vm1064_vm1, %v1537_v60 }
 0x511   : > { %v1540_v23 = vpop.f32.mrf.mxu2 }
 0x512   : > { %1544 = vst.msk [vmem:[%s344_s16 + $0x8] sm:$0xff] %vm1064_vm1, %v1540_v23 }
 0x513   : > { %2305 = shalt.err (!%p2302_p9)
}
 0x514   : > { %s2364_s25 = smov 128   ;;  %s2365_s13 = smov 8  }
 0x515   : > { %1964 = dma.vmem_to_hbm [thread:$0]  (%p2491_p11), %s1584_s17, 256, %s1586_s14, %s1567_s0, %s2364_s25, %s2364_s25, %s2365_s13  }
 0x516 PF: > { %s1613_s29 = sand.u32 1, %s2344_s18   ;;  %p4034_p1 = scmp.ge.s32.totalorder %s2356_s21, 2 }
 0x517   : > { %s1614_s1 = scalar_lea.sflag [#allocation4], %s1613_s29 }
 0x518   : > { %p1983_p3 = pnand %p4034_p1, %p2495_p12 }
 0x51a   : > { %p1984_p4 = pneg %p1983_p3 }
 0x51c   : > { %2335 = dma.done.wait (%p1984_p4), %s1614_s1, 256  }
 0x51d   : > { %2337 = vsyncadd (%p1984_p4), %s1614_s1, 4294967040  ;;  %s1624_s2 = scalar_lea.sflag [#allocation12], %s1613_s29 }
 0x51e   : > { %2339 = dma.done.wait (%p1984_p4), %s1624_s2, 16  }
 0x51f   : > { %2341 = vsyncadd (%p1984_p4), %s1624_s2, 4294967280  ;;  %s4035_s8 = sld [smem:[#allocation18_spill]]  ;;  %p26_p11 = scmp.ge.s32.totalorder %s2418_s22, 4  }
 0x520   : > { %s4036_s18 = smov %s2348_s19  ;;  %s4037_s19 = smov %s2352_s20 }
 0x521   : > { %s4039_s21 = smov %s2418_s22  ;;  %28 = sbr.rel (!%p26_p11) target bundleno = 14 (0xe), region = 127 }
 0x525   : > { %s4038_s20 = smov %s4035_s8 }
 0x526   :  { %1629 = vsyncpa [#allocation3], 1 }
 0x527   :  { %1631 = vsyncpa [#allocation3 + $0x1], 1 }
 0x528   :  { %1632 = vsyncpa [#allocation6], 1 }
 0x529   :  { %1634 = vsyncpa [#allocation6 + $0x1], 1 }
 0x52a   :  { %1635 = vsyncpa [#allocation9], 1 }
 0x52b   :  { %1637 = vsyncpa [#allocation9 + $0x1], 1 }
 0x52c   :  { %1638 = vsyncpa [#allocation4], 1 }
 0x52d   :  { %1640 = vsyncpa [#allocation4 + $0x1], 1 }
 0x52e   :  { %1641 = vsyncpa [#allocation12], 1 }
 0x52f   :  { %1643 = vsyncpa [#allocation12 + $0x1], 1 }

</bundles_post_ra>
